<compile_context>
chip_gen: v7x
topology: tpu7x:2x2x1
jax: 0.10.0
libtpu: 0.0.40
codegen_flags: <defaults>
</compile_context>

<pallas_src>
import jax
import jax.numpy as jnp
from jax.experimental import pallas as pl
from jax.experimental.pallas import tpu as pltpu

# ---- model hyper-parameters (from Classifier.__init__) ----------------------
VOCAB_SIZE = 50
EMB_DIM = 32
C1 = 200
C2 = 100
NUM_CLASSES = 3
KSIZE = 4
STRIDE = 2
PAD = 1
NEG_SLOPE = 0.1

# ---- lane/MXU friendly padded sizes ------------------------------------------
VP = 64                    # per-tap vocab slots (>= VOCAB_SIZE)
KVP = KSIZE * VP           # 256 : contraction dim of fused embedding+conv1 matmul
C1P = 256                  # conv1 channels padded
C2P = 128                  # conv2 channels padded
OUTP = 128                 # fc output padded (lane-dense output store)


def _round_up(x, m):
    return -(-x // m) * m


def _conv_out_len(L):
    return (L + 2 * PAD - KSIZE) // STRIDE + 1


# ---- the Pallas kernel (all hot-path compute lives here) ---------------------
def classifier_kernel(tok_e_ref, tok_o_ref, w1_ref, b1_ref, w2e_ref, w2o_ref,
                      b2_ref, wf_ref, bf_ref, out_ref):
    # tok_*_ref: (L1h, B, K) int32, rows ordered (conv1-output-position-major, sample-minor)
    L1h, B, K = tok_e_ref.shape
    M2 = L1h * B

    tok_e = tok_e_ref[...].reshape(M2, K)          # free: B is a multiple of 8
    tok_o = tok_o_ref[...].reshape(M2, K)

    viota = jax.lax.broadcasted_iota(jnp.int32, (M2, KVP), 1)

    def one_hot(tok2d):
        # taps are pre-offset into disjoint ranges [k*VP, k*VP+VOCAB); -1 = zero padding
        hit = tok2d[:, 0:1] == viota
        for k in range(1, K):
            hit = jnp.logical_or(hit, tok2d[:, k:k + 1] == viota)
        return hit.astype(jnp.bfloat16)

    b1 = b1_ref[...]                                                        # (1, C1P) f32
    # fused embedding + conv1 (one matmul per parity stream) + LeakyReLU
    E = jnp.dot(one_hot(tok_e), w1_ref[...], preferred_element_type=jnp.float32) + b1
    O = jnp.dot(one_hot(tok_o), w1_ref[...], preferred_element_type=jnp.float32) + b1
    E = jnp.where(E > 0, E, NEG_SLOPE * E).astype(jnp.bfloat16)             # (M2, C1P)
    O = jnp.where(O > 0, O, NEG_SLOPE * O).astype(jnp.bfloat16)             # (M2, C1P)

    # conv2: taps 1,3 read the even-t stream E, taps 0,2 read the odd-t stream O.
    # Weights are horizontally stacked so each matmul has a full 256-wide output.
    UE = jnp.dot(E, w2e_ref[...], preferred_element_type=jnp.float32)       # [tap1 | tap3]
    UO = jnp.dot(O, w2o_ref[...], preferred_element_type=jnp.float32)       # [tap0 | tap2]

    # taps 0 / 3 need a +/- one-position shift = whole B-row block shift (zero padded)
    zb = jnp.zeros((B, C2P), jnp.float32)
    t0 = jnp.concatenate([zb, UO[:M2 - B, :C2P]], axis=0)                   # tap0 shifted down
    t3 = jnp.concatenate([UE[B:, C2P:], zb], axis=0)                        # tap3 shifted up
    y2 = t0 + UE[:, :C2P] + UO[:, C2P:] + t3 + b2_ref[...]                  # (M2, C2P)

    # global max over length: rows are position-major, so reduce over L2 row-blocks
    mx = y2[0:B, :]
    for u in range(1, L1h):
        mx = jnp.maximum(mx, y2[u * B:(u + 1) * B, :])                      # (B, C2P)

    # final fully-connected layer (f32), lane-dense (B, 128) store
    out_ref[...] = jnp.dot(mx, wf_ref[...], preferred_element_type=jnp.float32) + bf_ref[...]


# ---- wrapper: cheap glue (weight re-layout, integer token im2col) + pallas_call
def classifier_forward(x_tokens, params, block_b=128):
    N, L = x_tokens.shape
    assert L % 4 == 0 and L >= 8, "kernel assumes L % 4 == 0 (two stride-2 convs)"
    L1 = _conv_out_len(L)
    L2 = _conv_out_len(L1)
    L1h = L1 // 2
    assert L1 == L // 2 and L2 == L1h

    # fold embedding into conv1 weight:  y1[t,c] = b1[c] + sum_k emb[tok[2t-1+k]] . w1[c,:,k]
    w1e = jnp.einsum("ve,cek->kvc", params["emb"], params["w1"],
                     precision=jax.lax.Precision.HIGHEST)                    # (K, V, C1)
    w1p = jnp.zeros((KSIZE, VP, C1P), jnp.float32).at[:, :VOCAB_SIZE, :C1].set(w1e)
    w1p = w1p.reshape(KSIZE * VP, C1P).astype(jnp.bfloat16)                  # (256, 256)

    w2t = jnp.transpose(params["w2"], (2, 1, 0))                             # (K, C1, C2)
    w2p = jnp.zeros((KSIZE, C1P, C2P), jnp.float32).at[:, :C1, :C2].set(w2t)
    w2e = jnp.concatenate([w2p[1], w2p[3]], axis=1).astype(jnp.bfloat16)     # taps on E: (256, 256)
    w2o = jnp.concatenate([w2p[0], w2p[2]], axis=1).astype(jnp.bfloat16)     # taps on O: (256, 256)

    b1p = jnp.zeros((1, C1P), jnp.float32).at[0, :C1].set(params["b1"])
    b2p = jnp.zeros((1, C2P), jnp.float32).at[0, :C2].set(params["b2"])
    wfp = jnp.zeros((C2P, OUTP), jnp.float32).at[:C2, :NUM_CLASSES].set(params["wf"].T)
    bfp = jnp.zeros((1, OUTP), jnp.float32).at[0, :NUM_CLASSES].set(params["bf"])

    # integer im2col of tokens for conv1 (only int32 goes to HBM; ~16x less than f32 embeds)
    tp = jnp.pad(x_tokens.astype(jnp.int32), ((0, 0), (1, 1)), constant_values=-1)  # (N, L+2)
    pos = STRIDE * jnp.arange(L1)[:, None] + jnp.arange(KSIZE)[None, :]              # (L1, K)
    tok = tp[:, pos]                                                                 # (N, L1, K)
    tok = jnp.where(tok >= 0, tok + jnp.arange(KSIZE) * VP, -1)                      # per-tap offsets
    tok_e = jnp.transpose(tok[:, 0::2, :], (1, 0, 2))                                # (L1h, N, K)
    tok_o = jnp.transpose(tok[:, 1::2, :], (1, 0, 2))                                # (L1h, N, K)

    # batch tiling (B multiple of 8); pad batch with all-padding "samples"
    B = _round_up(min(block_b, _round_up(N, 8)), 8)
    N_pad = _round_up(N, B)
    if N_pad != N:
        padw = ((0, 0), (0, N_pad - N), (0, 0))
        tok_e = jnp.pad(tok_e, padw, constant_values=-1)
        tok_o = jnp.pad(tok_o, padw, constant_values=-1)

    out = pl.pallas_call(
        classifier_kernel,
        out_shape=jax.ShapeDtypeStruct((N_pad, OUTP), jnp.float32),
        grid_spec=pltpu.PrefetchScalarGridSpec(
            num_scalar_prefetch=0,
            grid=(N_pad // B,),
            in_specs=[
                pl.BlockSpec((L1h, B, KSIZE), lambda i: (0, i, 0)),   # tok_e
                pl.BlockSpec((L1h, B, KSIZE), lambda i: (0, i, 0)),   # tok_o
                pl.BlockSpec((KVP, C1P), lambda i: (0, 0)),           # fused emb+conv1 weight
                pl.BlockSpec((1, C1P), lambda i: (0, 0)),             # b1
                pl.BlockSpec((C1P, 2 * C2P), lambda i: (0, 0)),       # conv2 weights (E taps)
                pl.BlockSpec((C1P, 2 * C2P), lambda i: (0, 0)),       # conv2 weights (O taps)
                pl.BlockSpec((1, C2P), lambda i: (0, 0)),             # b2
                pl.BlockSpec((C2P, OUTP), lambda i: (0, 0)),          # fc weight
                pl.BlockSpec((1, OUTP), lambda i: (0, 0)),            # fc bias
            ],
            out_specs=pl.BlockSpec((B, OUTP), lambda i: (i, 0)),
        ),
        compiler_params=pltpu.CompilerParams(dimension_semantics=("parallel",)),
    )(tok_e, tok_o, w1p, b1p, w2e, w2o, b2p, wfp, bfp)
    return out[:N, :NUM_CLASSES]


# ---- pure-JAX reference for the correctness check -----------------------------
def reference_forward(x_tokens, params):
    xe = params["emb"][x_tokens]                              # (N, L, E)
    x = jnp.transpose(xe, (0, 2, 1))                          # (N, E, L)

    def conv1d(x, w, b):
        y = jax.lax.conv_general_dilated(
            x, w, window_strides=(STRIDE,), padding=[(PAD, PAD)],
            dimension_numbers=("NCH", "OIH", "NCH"),
            precision=jax.lax.Precision.HIGHEST)
        return y + b[None, :, None]

    y = conv1d(x, params["w1"], params["b1"])
    y = jnp.where(y > 0, y, NEG_SLOPE * y)
    y = conv1d(y, params["w2"], params["b2"])
    y = jnp.max(y, axis=2)                                    # (N, C2)
    return y @ params["wf"].T + params["bf"]                  # (N, 3)


if __name__ == "__main__":
    key = jax.random.PRNGKey(0)
    k_x1, k_x2, k_emb, k_w1, k_b1, k_w2, k_b2, k_wf, k_bf = jax.random.split(key, 9)

    params = dict(
        emb=0.1 * jax.random.normal(k_emb, (VOCAB_SIZE, EMB_DIM), jnp.float32),
        w1=0.1 * jax.random.normal(k_w1, (C1, EMB_DIM, KSIZE), jnp.float32),   # torch conv1 weight
        b1=0.1 * jax.random.normal(k_b1, (C1,), jnp.float32),
        w2=0.1 * jax.random.normal(k_w2, (C2, C1, KSIZE), jnp.float32),        # torch conv2 weight
        b2=0.1 * jax.random.normal(k_b2, (C2,), jnp.float32),
        wf=0.1 * jax.random.normal(k_wf, (NUM_CLASSES, C2), jnp.float32),      # torch fc weight
        bf=0.1 * jax.random.normal(k_bf, (NUM_CLASSES,), jnp.float32),
    )

    # test 1: small batch (single grid step, batch padded up to B=8)
    N, L = 2, 16
    x1 = jax.random.randint(k_x1, (N, L), 0, VOCAB_SIZE)
    out1 = jax.block_until_ready(classifier_forward(x1, params))
    ref1 = jax.block_until_ready(reference_forward(x1, params))
    assert out1.shape == (N, NUM_CLASSES), out1.shape
    assert jnp.allclose(out1, ref1, atol=2e-2, rtol=2e-2), (out1, ref1)

    # test 2: several batch tiles (grid > 1) with batch padding
    N2 = 20
    x2 = jax.random.randint(k_x2, (N2, L), 0, VOCAB_SIZE)
    out2 = jax.block_until_ready(classifier_forward(x2, params, block_b=8))
    ref2 = jax.block_until_ready(reference_forward(x2, params))
    assert out2.shape == (N2, NUM_CLASSES), out2.shape
    assert jnp.allclose(out2, ref2, atol=2e-2, rtol=2e-2), (out2, ref2)

    print("KERNEL_OK")
</pallas_src>

<mosaic_0001>
module attributes {stable_mosaic.version = 11 : i64} {
  func.func @classifier_kernel(%arg0: i32, %arg1: memref<4x8x4xi32, #tpu.memory_space<vmem>>, %arg2: memref<4x8x4xi32, #tpu.memory_space<vmem>>, %arg3: memref<256x256xbf16, #tpu.memory_space<vmem>>, %arg4: memref<1x256xf32, #tpu.memory_space<vmem>>, %arg5: memref<256x256xbf16, #tpu.memory_space<vmem>>, %arg6: memref<256x256xbf16, #tpu.memory_space<vmem>>, %arg7: memref<1x128xf32, #tpu.memory_space<vmem>>, %arg8: memref<128x128xf32, #tpu.memory_space<vmem>>, %arg9: memref<1x128xf32, #tpu.memory_space<vmem>>, %arg10: memref<8x128xf32, #tpu.memory_space<vmem>>) attributes {dimension_semantics = [#tpu.dimension_semantics<parallel>], iteration_bounds = array<i64: 1>, scalar_prefetch = 0 : i64, scratch_operands = 0 : i64, tpu.core_type = #tpu.core_type<tc>, window_params = [{transform_indices = @transform_0, window_bounds = array<i64: 4, 8, 4>}, {transform_indices = @transform_1, window_bounds = array<i64: 4, 8, 4>}, {pipeline_mode = #tpu.pipeline_mode<synchronous>, transform_indices = @transform_2, window_bounds = array<i64: 256, 256>}, {pipeline_mode = #tpu.pipeline_mode<synchronous>, transform_indices = @transform_3, window_bounds = array<i64: 1, 256>}, {pipeline_mode = #tpu.pipeline_mode<synchronous>, transform_indices = @transform_4, window_bounds = array<i64: 256, 256>}, {pipeline_mode = #tpu.pipeline_mode<synchronous>, transform_indices = @transform_5, window_bounds = array<i64: 256, 256>}, {pipeline_mode = #tpu.pipeline_mode<synchronous>, transform_indices = @transform_6, window_bounds = array<i64: 1, 128>}, {pipeline_mode = #tpu.pipeline_mode<synchronous>, transform_indices = @transform_7, window_bounds = array<i64: 128, 128>}, {pipeline_mode = #tpu.pipeline_mode<synchronous>, transform_indices = @transform_8, window_bounds = array<i64: 1, 128>}, {transform_indices = @transform_9, window_bounds = array<i64: 8, 128>}]} {
    %c0 = arith.constant 0 : index
    %c0_0 = arith.constant 0 : index
    %c0_1 = arith.constant 0 : index
    %0 = vector.load %arg1[%c0, %c0_0, %c0_1] : memref<4x8x4xi32, #tpu.memory_space<vmem>>, vector<4x8x4xi32>
    %1 = vector.shape_cast %0 : vector<4x8x4xi32> to vector<32x4xi32>
    %c0_2 = arith.constant 0 : index
    %c0_3 = arith.constant 0 : index
    %c0_4 = arith.constant 0 : index
    %2 = vector.load %arg2[%c0_2, %c0_3, %c0_4] : memref<4x8x4xi32, #tpu.memory_space<vmem>>, vector<4x8x4xi32>
    %3 = vector.shape_cast %2 : vector<4x8x4xi32> to vector<32x4xi32>
    %4 = tpu.iota {dimensions = array<i32: 1>} : vector<32x256xi32>
    %c0_5 = arith.constant 0 : index
    %c0_6 = arith.constant 0 : index
    %5 = vector.load %arg4[%c0_5, %c0_6] : memref<1x256xf32, #tpu.memory_space<vmem>>, vector<1x256xf32>
    %6 = vector.extract_strided_slice %1 {offsets = [0, 0], sizes = [32, 1], strides = [1, 1]} : vector<32x4xi32> to vector<32x1xi32>
    %7 = vector.broadcast %6 : vector<32x1xi32> to vector<32x256xi32>
    %8 = arith.cmpi eq, %7, %4 : vector<32x256xi32>
    %9 = vector.extract_strided_slice %1 {offsets = [0, 1], sizes = [32, 1], strides = [1, 1]} : vector<32x4xi32> to vector<32x1xi32>
    %10 = vector.broadcast %9 : vector<32x1xi32> to vector<32x256xi32>
    %11 = arith.cmpi eq, %10, %4 : vector<32x256xi32>
    %12 = arith.ori %8, %11 : vector<32x256xi1>
    %13 = vector.extract_strided_slice %1 {offsets = [0, 2], sizes = [32, 1], strides = [1, 1]} : vector<32x4xi32> to vector<32x1xi32>
    %14 = vector.broadcast %13 : vector<32x1xi32> to vector<32x256xi32>
    %15 = arith.cmpi eq, %14, %4 : vector<32x256xi32>
    %16 = arith.ori %12, %15 : vector<32x256xi1>
    %17 = vector.extract_strided_slice %1 {offsets = [0, 3], sizes = [32, 1], strides = [1, 1]} : vector<32x4xi32> to vector<32x1xi32>
    %18 = vector.broadcast %17 : vector<32x1xi32> to vector<32x256xi32>
    %19 = arith.cmpi eq, %18, %4 : vector<32x256xi32>
    %20 = arith.ori %16, %19 : vector<32x256xi1>
    %21 = arith.extui %20 : vector<32x256xi1> to vector<32x256xi32>
    %22 = arith.sitofp %21 : vector<32x256xi32> to vector<32x256xf32>
    %23 = arith.truncf %22 : vector<32x256xf32> to vector<32x256xbf16>
    %c0_7 = arith.constant 0 : index
    %c0_8 = arith.constant 0 : index
    %24 = vector.load %arg3[%c0_7, %c0_8] : memref<256x256xbf16, #tpu.memory_space<vmem>>, vector<256x256xbf16>
    %cst = arith.constant dense<0.000000e+00> : vector<32x256xf32>
    %25 = tpu.matmul %23, %24, %cst {dimension_numbers = #tpu.dot_dimension_numbers<[1], [0], [0], [1], [0, 0, 1, 1], [], []>} : vector<32x256xbf16>, vector<256x256xbf16>, vector<32x256xf32> -> vector<32x256xf32>
    %26 = vector.broadcast %5 : vector<1x256xf32> to vector<32x256xf32>
    %27 = arith.addf %25, %26 : vector<32x256xf32>
    %28 = vector.extract_strided_slice %3 {offsets = [0, 0], sizes = [32, 1], strides = [1, 1]} : vector<32x4xi32> to vector<32x1xi32>
    %29 = vector.broadcast %28 : vector<32x1xi32> to vector<32x256xi32>
    %30 = arith.cmpi eq, %29, %4 : vector<32x256xi32>
    %31 = vector.extract_strided_slice %3 {offsets = [0, 1], sizes = [32, 1], strides = [1, 1]} : vector<32x4xi32> to vector<32x1xi32>
    %32 = vector.broadcast %31 : vector<32x1xi32> to vector<32x256xi32>
    %33 = arith.cmpi eq, %32, %4 : vector<32x256xi32>
    %34 = arith.ori %30, %33 : vector<32x256xi1>
    %35 = vector.extract_strided_slice %3 {offsets = [0, 2], sizes = [32, 1], strides = [1, 1]} : vector<32x4xi32> to vector<32x1xi32>
    %36 = vector.broadcast %35 : vector<32x1xi32> to vector<32x256xi32>
    %37 = arith.cmpi eq, %36, %4 : vector<32x256xi32>
    %38 = arith.ori %34, %37 : vector<32x256xi1>
    %39 = vector.extract_strided_slice %3 {offsets = [0, 3], sizes = [32, 1], strides = [1, 1]} : vector<32x4xi32> to vector<32x1xi32>
    %40 = vector.broadcast %39 : vector<32x1xi32> to vector<32x256xi32>
    %41 = arith.cmpi eq, %40, %4 : vector<32x256xi32>
    %42 = arith.ori %38, %41 : vector<32x256xi1>
    %43 = arith.extui %42 : vector<32x256xi1> to vector<32x256xi32>
    %44 = arith.sitofp %43 : vector<32x256xi32> to vector<32x256xf32>
    %45 = arith.truncf %44 : vector<32x256xf32> to vector<32x256xbf16>
    %c0_9 = arith.constant 0 : index
    %c0_10 = arith.constant 0 : index
    %46 = vector.load %arg3[%c0_9, %c0_10] : memref<256x256xbf16, #tpu.memory_space<vmem>>, vector<256x256xbf16>
    %cst_11 = arith.constant dense<0.000000e+00> : vector<32x256xf32>
    %47 = tpu.matmul %45, %46, %cst_11 {dimension_numbers = #tpu.dot_dimension_numbers<[1], [0], [0], [1], [0, 0, 1, 1], [], []>} : vector<32x256xbf16>, vector<256x256xbf16>, vector<32x256xf32> -> vector<32x256xf32>
    %48 = vector.broadcast %5 : vector<1x256xf32> to vector<32x256xf32>
    %49 = arith.addf %47, %48 : vector<32x256xf32>
    %cst_12 = arith.constant 0.000000e+00 : f32
    %50 = vector.broadcast %cst_12 : f32 to vector<32x256xf32>
    %51 = arith.cmpf ogt, %27, %50 : vector<32x256xf32>
    %cst_13 = arith.constant 1.000000e-01 : f32
    %52 = vector.broadcast %cst_13 : f32 to vector<32x256xf32>
    %53 = arith.mulf %52, %27 : vector<32x256xf32>
    %54 = arith.select %51, %27, %53 : vector<32x256xi1>, vector<32x256xf32>
    %55 = arith.truncf %54 : vector<32x256xf32> to vector<32x256xbf16>
    %cst_14 = arith.constant 0.000000e+00 : f32
    %56 = vector.broadcast %cst_14 : f32 to vector<32x256xf32>
    %57 = arith.cmpf ogt, %49, %56 : vector<32x256xf32>
    %cst_15 = arith.constant 1.000000e-01 : f32
    %58 = vector.broadcast %cst_15 : f32 to vector<32x256xf32>
    %59 = arith.mulf %58, %49 : vector<32x256xf32>
    %60 = arith.select %57, %49, %59 : vector<32x256xi1>, vector<32x256xf32>
    %61 = arith.truncf %60 : vector<32x256xf32> to vector<32x256xbf16>
    %c0_16 = arith.constant 0 : index
    %c0_17 = arith.constant 0 : index
    %62 = vector.load %arg5[%c0_16, %c0_17] : memref<256x256xbf16, #tpu.memory_space<vmem>>, vector<256x256xbf16>
    %cst_18 = arith.constant dense<0.000000e+00> : vector<32x256xf32>
    %63 = tpu.matmul %55, %62, %cst_18 {dimension_numbers = #tpu.dot_dimension_numbers<[1], [0], [0], [1], [0, 0, 1, 1], [], []>} : vector<32x256xbf16>, vector<256x256xbf16>, vector<32x256xf32> -> vector<32x256xf32>
    %c0_19 = arith.constant 0 : index
    %c0_20 = arith.constant 0 : index
    %64 = vector.load %arg6[%c0_19, %c0_20] : memref<256x256xbf16, #tpu.memory_space<vmem>>, vector<256x256xbf16>
    %cst_21 = arith.constant dense<0.000000e+00> : vector<32x256xf32>
    %65 = tpu.matmul %61, %64, %cst_21 {dimension_numbers = #tpu.dot_dimension_numbers<[1], [0], [0], [1], [0, 0, 1, 1], [], []>} : vector<32x256xbf16>, vector<256x256xbf16>, vector<32x256xf32> -> vector<32x256xf32>
    %cst_22 = arith.constant 0.000000e+00 : f32
    %66 = vector.broadcast %cst_22 : f32 to vector<8x128xf32>
    %67 = vector.extract_strided_slice %65 {offsets = [0, 0], sizes = [24, 128], strides = [1, 1]} : vector<32x256xf32> to vector<24x128xf32>
    %68 = tpu.concatenate %66, %67 in 0 : vector<8x128xf32>, vector<24x128xf32> -> vector<32x128xf32>
    %69 = vector.extract_strided_slice %63 {offsets = [8, 128], sizes = [24, 128], strides = [1, 1]} : vector<32x256xf32> to vector<24x128xf32>
    %70 = tpu.concatenate %69, %66 in 0 : vector<24x128xf32>, vector<8x128xf32> -> vector<32x128xf32>
    %71 = vector.extract_strided_slice %63 {offsets = [0, 0], sizes = [32, 128], strides = [1, 1]} : vector<32x256xf32> to vector<32x128xf32>
    %72 = arith.addf %68, %71 : vector<32x128xf32>
    %73 = vector.extract_strided_slice %65 {offsets = [0, 128], sizes = [32, 128], strides = [1, 1]} : vector<32x256xf32> to vector<32x128xf32>
    %74 = arith.addf %72, %73 : vector<32x128xf32>
    %75 = arith.addf %74, %70 : vector<32x128xf32>
    %c0_23 = arith.constant 0 : index
    %c0_24 = arith.constant 0 : index
    %76 = vector.load %arg7[%c0_23, %c0_24] : memref<1x128xf32, #tpu.memory_space<vmem>>, vector<1x128xf32>
    %77 = vector.broadcast %76 : vector<1x128xf32> to vector<32x128xf32>
    %78 = arith.addf %75, %77 : vector<32x128xf32>
    %79 = vector.extract_strided_slice %78 {offsets = [0, 0], sizes = [8, 128], strides = [1, 1]} : vector<32x128xf32> to vector<8x128xf32>
    %80 = vector.extract_strided_slice %78 {offsets = [8, 0], sizes = [8, 128], strides = [1, 1]} : vector<32x128xf32> to vector<8x128xf32>
    %81 = arith.maximumf %79, %80 : vector<8x128xf32>
    %82 = vector.extract_strided_slice %78 {offsets = [16, 0], sizes = [8, 128], strides = [1, 1]} : vector<32x128xf32> to vector<8x128xf32>
    %83 = arith.maximumf %81, %82 : vector<8x128xf32>
    %84 = vector.extract_strided_slice %78 {offsets = [24, 0], sizes = [8, 128], strides = [1, 1]} : vector<32x128xf32> to vector<8x128xf32>
    %85 = arith.maximumf %83, %84 : vector<8x128xf32>
    %c0_25 = arith.constant 0 : index
    %c0_26 = arith.constant 0 : index
    %86 = vector.load %arg8[%c0_25, %c0_26] : memref<128x128xf32, #tpu.memory_space<vmem>>, vector<128x128xf32>
    %cst_27 = arith.constant dense<0.000000e+00> : vector<8x128xf32>
    %87 = tpu.matmul %85, %86, %cst_27 {dimension_numbers = #tpu.dot_dimension_numbers<[1], [0], [0], [1], [0, 0, 1, 1], [], []>} : vector<8x128xf32>, vector<128x128xf32>, vector<8x128xf32> -> vector<8x128xf32>
    %c0_28 = arith.constant 0 : index
    %c0_29 = arith.constant 0 : index
    %88 = vector.load %arg9[%c0_28, %c0_29] : memref<1x128xf32, #tpu.memory_space<vmem>>, vector<1x128xf32>
    %89 = vector.broadcast %88 : vector<1x128xf32> to vector<8x128xf32>
    %90 = arith.addf %87, %89 : vector<8x128xf32>
    %c0_30 = arith.constant 0 : index
    %c0_31 = arith.constant 0 : index
    %91 = vector.load %arg10[%c0_30, %c0_31] : memref<8x128xf32, #tpu.memory_space<vmem>>, vector<8x128xf32>
    tpu.vector_store %arg10[%c0_30, %c0_31], %90 {strides = array<i32>} : memref<8x128xf32, #tpu.memory_space<vmem>>, vector<8x128xf32>,
    return
  }
  func.func @transform_0(%arg0: i32) -> (i32, i32, i32) {
    %c0_i32 = arith.constant 0 : i32
    %c0_i32_0 = arith.constant 0 : i32
    %c0_i32_1 = arith.constant 0 : i32
    return %c0_i32, %arg0, %c0_i32_0 : i32, i32, i32
  }
  func.func @transform_1(%arg0: i32) -> (i32, i32, i32) {
    %c0_i32 = arith.constant 0 : i32
    %c0_i32_0 = arith.constant 0 : i32
    %c0_i32_1 = arith.constant 0 : i32
    return %c0_i32, %arg0, %c0_i32_0 : i32, i32, i32
  }
  func.func @transform_2(%arg0: i32) -> (i32, i32) {
    %c0_i32 = arith.constant 0 : i32
    %c0_i32_0 = arith.constant 0 : i32
    %c0_i32_1 = arith.constant 0 : i32
    return %c0_i32, %c0_i32_0 : i32, i32
  }
  func.func @transform_3(%arg0: i32) -> (i32, i32) {
    %c0_i32 = arith.constant 0 : i32
    %c0_i32_0 = arith.constant 0 : i32
    %c0_i32_1 = arith.constant 0 : i32
    return %c0_i32, %c0_i32_0 : i32, i32
  }
  func.func @transform_4(%arg0: i32) -> (i32, i32) {
    %c0_i32 = arith.constant 0 : i32
    %c0_i32_0 = arith.constant 0 : i32
    %c0_i32_1 = arith.constant 0 : i32
    return %c0_i32, %c0_i32_0 : i32, i32
  }
  func.func @transform_5(%arg0: i32) -> (i32, i32) {
    %c0_i32 = arith.constant 0 : i32
    %c0_i32_0 = arith.constant 0 : i32
    %c0_i32_1 = arith.constant 0 : i32
    return %c0_i32, %c0_i32_0 : i32, i32
  }
  func.func @transform_6(%arg0: i32) -> (i32, i32) {
    %c0_i32 = arith.constant 0 : i32
    %c0_i32_0 = arith.constant 0 : i32
    %c0_i32_1 = arith.constant 0 : i32
    return %c0_i32, %c0_i32_0 : i32, i32
  }
  func.func @transform_7(%arg0: i32) -> (i32, i32) {
    %c0_i32 = arith.constant 0 : i32
    %c0_i32_0 = arith.constant 0 : i32
    %c0_i32_1 = arith.constant 0 : i32
    return %c0_i32, %c0_i32_0 : i32, i32
  }
  func.func @transform_8(%arg0: i32) -> (i32, i32) {
    %c0_i32 = arith.constant 0 : i32
    %c0_i32_0 = arith.constant 0 : i32
    %c0_i32_1 = arith.constant 0 : i32
    return %c0_i32, %c0_i32_0 : i32, i32
  }
  func.func @transform_9(%arg0: i32) -> (i32, i32) {
    %c0_i32 = arith.constant 0 : i32
    %c0_i32_0 = arith.constant 0 : i32
    return %arg0, %c0_i32 : i32, i32
  }
}

</mosaic_0001>

<bundles_post_ra>
// kernel: tpu_custom_call.1
= control target key start
LH: loop header
LB: loop body
LE: loop exit
PB: predicated region body
PF: predicated region fallthrough
CT: control target
= control target key end

     0   :  { %14 = vsyncpa [#allocation3], 0  ;;  %s2389_s0 = inlined_call_operand.vmem [shape: s32[4,8,4], index: 0, kind: input, shape index: {}]   ;;  %s2390_s1 = inlined_call_operand.vmem [shape: s32[4,8,4], index: 1, kind: input, shape index: {}]   ;;  %s2391_s2 = inlined_call_operand.hbm [shape: bf16[256,256], index: 2, kind: input, shape index: {}]   ;;  %s2392_s3 = inlined_call_operand.vmem [shape: f32[1,256], index: 3, kind: input, shape index: {}]   ;;  %s2393_s4 = inlined_call_operand.hbm [shape: bf16[256,256], index: 4, kind: input, shape index: {}]   ;;  %s2394_s5 = inlined_call_operand.hbm [shape: bf16[256,256], index: 5, kind: input, shape index: {}]   ;;  %s2395_s6 = inlined_call_operand.vmem [shape: f32[1,128], index: 6, kind: input, shape index: {}]   ;;  %s2396_s7 = inlined_call_operand.hbm [shape: f32[128,128], index: 7, kind: input, shape index: {}]   ;;  %s2397_s8 = inlined_call_operand.vmem [shape: f32[1,128], index: 8, kind: input, shape index: {}]   ;;  %s2398_s9 = inlined_call_operand.hbm [shape: f32[8,128], index: 9, kind: output, shape index: {}]  }
   0x1   :  { %15 = vsyncpa [#allocation6], 0 }
   0x2   :  { %16 = vsyncpa [#allocation9], 0 }
   0x3   :  { %17 = vsyncpa [#allocation4], 0  ;;  %s1842_s30 = smov [#allocation5]   ;;  %s1843_s11 = smov [#allocation2]  }
   0x4   :  { %s41_s10 = sshll.u32 %s1842_s30, 4  ;;  %s27_s12 = sshll.u32 %s1843_s11, 4  ;;  %s42_s10 = int_to_ptr.vmem [resolvable:$true] %s41_s10  ;;  %s1907_s12 = int_to_ptr.vmem [resolvable:$true] %s27_s12 }
   0x5   :  { %s1724_s15 = scalar_lea.hbm %s2393_s4, 4096 }
   0x6   :  { %p1725_p0 = scmp.ne.s32.totalorder %s2393_s4, %s1724_s15  ;;  %p1728_p1 = scmp.lt.u32.totalorder %s1724_s15, %s2393_s4 }
   0x8   :  { %p1730_p2 = pnand %p1728_p1, %p1725_p0 }
   0xa   :  { %1733 = shalt.err (!%p1730_p2)
}
   0xb   :  { %s1734_s20 = scalar_lea.vmem %s42_s10, 4096  ;;  %p1739_p4 = scmp.lt.s32.totalorder %s42_s10, %s42_s10 }
   0xc   :  { %p1735_p3 = scmp.ne.s32.totalorder %s42_s10, %s1734_s20  ;;  %p1740_p5 = scmp.lt.s32.totalorder %s1734_s20, %s1734_s20 }
   0xe   :  { %p1741_p6 = por %p1740_p5, %p1739_p4 }
  0x10   :  { %p1742_p7 = pnand %p1741_p6, %p1735_p3 }
  0x12   :  { %1745 = shalt.err (!%p1742_p7)
}
  0x13   :  { %s1844_s21 = smov 128   ;;  %s1845_s22 = smov 8  }
  0x14   :  { %47 = dma.hbm_to_vmem [thread:$0]  %s2393_s4, 4096, %s42_s10, [#allocation6], %s1844_s21, %s1844_s21, %s1845_s22  }
  0x15   :  { %s1746_s27 = scalar_lea.hbm %s2391_s2, 4096 }
  0x16   :  { %p1747_p8 = scmp.ne.s32.totalorder %s2391_s2, %s1746_s27  ;;  %p1750_p9 = scmp.lt.u32.totalorder %s1746_s27, %s2391_s2 }
  0x18   :  { %p1752_p10 = pnand %p1750_p9, %p1747_p8 }
  0x1a   :  { %1755 = shalt.err (!%p1752_p10)
}
  0x1b   :  { %s1756_s13 = scalar_lea.vmem %s1907_s12, 4096  ;;  %p1761_p12 = scmp.lt.s32.totalorder %s1907_s12, %s1907_s12 }
  0x1c   :  { %p1757_p11 = scmp.ne.s32.totalorder %s1907_s12, %s1756_s13  ;;  %p1762_p13 = scmp.lt.s32.totalorder %s1756_s13, %s1756_s13 }
  0x1e   :  { %p1763_p0 = por %p1762_p13, %p1761_p12 }
  0x20   :  { %p1764_p1 = pnand %p1763_p0, %p1757_p11 }
  0x22   :  { %1767 = shalt.err (!%p1764_p1)
}
  0x23   :  { %33 = dma.hbm_to_vmem [thread:$0]  %s2391_s2, 4096, %s1907_s12, [#allocation3], %s1844_s21, %s1844_s21, %s1845_s22  }
  0x24   :  { %s1846_s14 = smov [#allocation7]   ;;  %s1847_s16 = smov [#allocation8]  }
  0x25   :  { %s53_s15 = sshll.u32 %s1846_s14, 4  ;;  %s67_s17 = sshll.u32 %s1847_s16, 4  ;;  %s54_s15 = int_to_ptr.vmem [resolvable:$true] %s53_s15  ;;  %s1944_s17 = int_to_ptr.vmem [resolvable:$true] %s67_s17 }
  0x26   :  { %s1768_s20 = scalar_lea.hbm %s2394_s5, 4096 }
  0x27   :  { %p1769_p2 = scmp.ne.s32.totalorder %s2394_s5, %s1768_s20  ;;  %p1772_p3 = scmp.lt.u32.totalorder %s1768_s20, %s2394_s5 }
  0x29   :  { %p1774_p4 = pnand %p1772_p3, %p1769_p2 }
  0x2b   :  { %1777 = shalt.err (!%p1774_p4)
}
  0x2c   :  { %s1778_s2 = scalar_lea.vmem %s54_s15, 4096  ;;  %p1783_p6 = scmp.lt.s32.totalorder %s54_s15, %s54_s15 }
  0x2d   :  { %p1779_p5 = scmp.ne.s32.totalorder %s54_s15, %s1778_s2  ;;  %p1784_p7 = scmp.lt.s32.totalorder %s1778_s2, %s1778_s2 }
  0x2f   :  { %p1785_p8 = por %p1784_p7, %p1783_p6 }
  0x31   :  { %p1786_p9 = pnand %p1785_p8, %p1779_p5 }
  0x33   :  { %1789 = shalt.err (!%p1786_p9)
}
  0x34   :  { %59 = dma.hbm_to_vmem [thread:$0]  %s2394_s5, 4096, %s54_s15, [#allocation6], %s1844_s21, %s1844_s21, %s1845_s22  }
  0x35   :  { %s1790_s30 = scalar_lea.hbm %s2396_s7, 2048 }
  0x36   :  { %p1791_p10 = scmp.ne.s32.totalorder %s2396_s7, %s1790_s30  ;;  %p1794_p11 = scmp.lt.u32.totalorder %s1790_s30, %s2396_s7 }
  0x38   :  { %p1796_p12 = pnand %p1794_p11, %p1791_p10 }
  0x3a   :  { %1799 = shalt.err (!%p1796_p12)
}
  0x3b   :  { %s1800_s14 = scalar_lea.vmem %s1944_s17, 2048  ;;  %p1805_p0 = scmp.lt.s32.totalorder %s1944_s17, %s1944_s17 }
  0x3c   :  { %p1801_p13 = scmp.ne.s32.totalorder %s1944_s17, %s1800_s14  ;;  %p1806_p1 = scmp.lt.s32.totalorder %s1800_s14, %s1800_s14 }
  0x3e   :  { %p1807_p2 = por %p1806_p1, %p1805_p0 }
  0x40   :  { %p1808_p3 = pnand %p1807_p2, %p1801_p13 }
  0x42   :  { %1811 = shalt.err (!%p1808_p3)
}
  0x43   :  { %73 = dma.hbm_to_vmem [thread:$0]  %s2396_s7, 2048, %s1944_s17, [#allocation9], %s1844_s21, %s1844_s21, %s1845_s22  }
  0x44   :  { %1834 = dma.done.wait [#allocation3], 4096  }
  0x45   :  { %1835 = vsyncadd [#allocation3], 4294963200 }
  0x46   :  { %1836 = dma.done.wait [#allocation6], 8192  }
  0x47   :  { %1837 = vsyncadd [#allocation6], 4294959104 }
  0x48   :  { %1838 = dma.done.wait [#allocation9], 2048  }
  0x49   :  { %1839 = vsyncadd [#allocation9], 4294965248  ;;  %v1848_v0 = vmov 1   ;;  %v1849_v1 = vmov 0   ;;  %v1986_v2 = vld [vmem:[%s2389_s0] sm:$0xff]  ;;  %v89_v3 = vld [vmem:[%s2389_s0 + $0x8] sm:$0xff]  ;;  %v96_v54 = vlaneseq }
  0x4a   :  { %1560 = vset.pattern.permute.xlu1 %v1848_v0  ;;  %1559 = vset.pattern.permute.xlu0 %v1849_v1  ;;  %v1580_v4 = vld [vmem:[#allocation2 + $0x4] ss:$8 sps:$4 sm:$0xff]   ;;  %v1582_v5 = vld [vmem:[#allocation2] ss:$8 sps:$4 sm:$0xff]   ;;  %v1583_v6 = vld [vmem:[#allocation2 + $0x14] ss:$8 sps:$4 sm:$0xff]  }
  0x4b   :  { %121 = vperm.xlu1 %1560, %v1986_v2   ;;  %101 = vperm.xlu0 %1559, %v1986_v2   ;;  %v1850_v7 = vmov 3   ;;  %v1585_v8 = vld [vmem:[#allocation2 + $0x10] ss:$8 sps:$4 sm:$0xff]   ;;  %v1586_v9 = vld [vmem:[#allocation2 + $0x24] ss:$8 sps:$4 sm:$0xff]   ;;  %v1851_v10 = vmov 2  }
  0x4c   :  { %427 = vmatprep.subr.bf16.mxu0 %v1580_v4  ;;  %604 = vmatprep.subr.bf16.mxu1 %v1580_v4  ;;  %v2000_v11 = vld [vmem:[%s2390_s1] sm:$0xff]  ;;  %v2005_v12 = vld [vmem:[%s2390_s1 + $0x8] sm:$0xff]  ;;  %v1589_v14 = vld [vmem:[#allocation2 + $0x34] ss:$8 sps:$4 sm:$0xff]   ;;  %v2073_v57 = vand.u32 127, %v96_v54  ;;  %v2399_v63 = vmov 0 }
  0x4d   :  { %428 = vmatpush1.bf16.msra.mxu0 %v1582_v5  ;;  %605 = vmatpush1.bf16.msra.mxu1 %v1582_v5  ;;  %v1588_v13 = vld [vmem:[#allocation2 + $0x20] ss:$8 sps:$4 sm:$0xff]   ;;  %v2013_v15 = vld [vmem:[%s2389_s0 + $0x10] sm:$0xff]  ;;  %v1592_v17 = vld [vmem:[#allocation2 + $0x44] ss:$8 sps:$4 sm:$0xff]   ;;  %v2405_v5 = vmov 0 }
  0x4e   :  { %429 = vmatprep.subr.bf16.mxu0 %v1583_v6  ;;  %606 = vmatprep.subr.bf16.mxu1 %v1583_v6  ;;  %v1591_v16 = vld [vmem:[#allocation2 + $0x30] ss:$8 sps:$4 sm:$0xff]   ;;  %v1594_v19 = vld [vmem:[#allocation2 + $0x40] ss:$8 sps:$4 sm:$0xff]   ;;  %v1595_v20 = vld [vmem:[#allocation2 + $0x54] ss:$8 sps:$4 sm:$0xff]  }
  0x4f   :  { %124 = vperm.xlu1 %1560, %v89_v3   ;;  %1564 = vset.pattern.permute.xlu0 %v1850_v7  ;;  %v2018_v18 = vld [vmem:[%s2390_s1 + $0x10] sm:$0xff]  ;;  %v2027_v21 = vld [vmem:[%s2389_s0 + $0x18] sm:$0xff]  ;;  %v1598_v23 = vld [vmem:[#allocation2 + $0x64] ss:$8 sps:$4 sm:$0xff]   ;;  %v2078_v60 = vadd.s32 128, %v2073_v57  ;;  %s1856_s11 = smov [#allocation10]  }
  0x50   :  { %177 = vperm.xlu0 %1564, %v1986_v2   ;;  %v1597_v22 = vld [vmem:[#allocation2 + $0x50] ss:$8 sps:$4 sm:$0xff]   ;;  %v1600_v25 = vld [vmem:[#allocation2 + $0x60] ss:$8 sps:$4 sm:$0xff]   ;;  %v1601_v26 = vld [vmem:[#allocation2 + $0x74] ss:$8 sps:$4 sm:$0xff]  }
  0x51   :  { %430 = vmatpush1.bf16.msra.mxu0 %v1585_v8  ;;  %607 = vmatpush1.bf16.msra.mxu1 %v1585_v8  ;;  %v2034_v24 = vld [vmem:[%s2390_s1 + $0x18] sm:$0xff]  ;;  %v1604_v28 = vld [vmem:[#allocation2 + $0x84] ss:$8 sps:$4 sm:$0xff]   ;;  %v1606_v29 = vld [vmem:[#allocation2 + $0x80] ss:$8 sps:$4 sm:$0xff]   ;;  %s1327_s13 = sshll.u32 %s1856_s11, 4  ;;  %s1328_s13 = int_to_ptr.vmem [resolvable:$true] %s1327_s13 }
  0x52   :  { %431 = vmatprep.subr.bf16.mxu0 %v1586_v9  ;;  %608 = vmatprep.subr.bf16.mxu1 %v1586_v9  ;;  %v1603_v27 = vld [vmem:[#allocation2 + $0x70] ss:$8 sps:$4 sm:$0xff]   ;;  %v1607_v30 = vld [vmem:[#allocation2 + $0x94] ss:$8 sps:$4 sm:$0xff]   ;;  %v1610_v32 = vld [vmem:[#allocation2 + $0xa4] ss:$8 sps:$4 sm:$0xff]   ;;  %p1817_p5 = scmp.lt.s32.totalorder %s1328_s13, %s1328_s13 }
  0x53   :  { %1561 = vset.pattern.permute.xlu1 %v1851_v10  ;;  %v1609_v31 = vld [vmem:[#allocation2 + $0x90] ss:$8 sps:$4 sm:$0xff]   ;;  %v1612_v33 = vld [vmem:[#allocation2 + $0xa0] ss:$8 sps:$4 sm:$0xff]   ;;  %v1613_v34 = vld [vmem:[#allocation2 + $0xb4] ss:$8 sps:$4 sm:$0xff]  }
  0x54   :  { %152 = vperm.xlu1 %1561, %v89_v3   ;;  %1565 = vset.pattern.permute.xlu0 %v1849_v1  ;;  %v1615_v35 = vld [vmem:[#allocation2 + $0xb0] ss:$8 sps:$4 sm:$0xff]   ;;  %v1616_v36 = vld [vmem:[#allocation2 + $0xc4] ss:$8 sps:$4 sm:$0xff]   ;;  %v1618_v37 = vld [vmem:[#allocation2 + $0xc0] ss:$8 sps:$4 sm:$0xff]  }
  0x55   :  { %104 = vperm.xlu0 %1565, %v89_v3   ;;  %432 = vmatpush1.bf16.msra.mxu0 %v1588_v13  ;;  %v1619_v38 = vld [vmem:[#allocation2 + $0xd4] ss:$8 sps:$4 sm:$0xff]   ;;  %v1621_v39 = vld [vmem:[#allocation2 + $0xd0] ss:$8 sps:$4 sm:$0xff]   ;;  %v1622_v40 = vld [vmem:[#allocation2 + $0xe4] ss:$8 sps:$4 sm:$0xff]  }
  0x56   :  { %609 = vmatpush1.bf16.msra.mxu1 %v1588_v13  ;;  %433 = vmatprep.subr.bf16.mxu0 %v1589_v14  ;;  %v1624_v41 = vld [vmem:[#allocation2 + $0xe0] ss:$8 sps:$4 sm:$0xff]   ;;  %v1625_v42 = vld [vmem:[#allocation2 + $0xf4] ss:$8 sps:$4 sm:$0xff]   ;;  %v1627_v43 = vld [vmem:[#allocation2 + $0xf0] ss:$8 sps:$4 sm:$0xff]  }
  0x57   :  { %610 = vmatprep.subr.bf16.mxu1 %v1589_v14  ;;  %v1630_v44 = vld [vmem:[#allocation5 + $0x4] ss:$8 sps:$4 sm:$0xff]   ;;  %v2412_v9 = vmov 0  ;;  %v1628_v14 = vld [vmem:[#allocation5] ss:$8 sps:$4 sm:$0xff]   ;;  %s1812_s4 = scalar_lea.vmem %s1328_s13, 128 }
  0x58   :  { %1562 = vset.pattern.permute.xlu1 %v1849_v1  ;;  %v1636_v45 = vld [vmem:[#allocation7 + $0x4] ss:$8 sps:$4 sm:$0xff]   ;;  %p1813_p4 = scmp.ne.s32.totalorder %s1328_s13, %s1812_s4  ;;  %p1818_p6 = scmp.lt.s32.totalorder %s1812_s4, %s1812_s4 }
  0x59   :  { %481 = vperm.xlu1 %1562, %v2000_v11   ;;  %484 = vperm.xlu0 %1565, %v2005_v12  }
  0x5a   :  { %434 = vmatpush1.bf16.msra.mxu0 %v1591_v16  ;;  %611 = vmatpush1.bf16.msra.mxu1 %v1591_v16  ;;  %v1685_v16 = vld [vmem:[#allocation5 + $0xa0] ss:$8 sps:$4 sm:$0xff]   ;;  %p1819_p7 = por %p1818_p6, %p1817_p5 }
  0x5b   :  { %435 = vmatprep.subr.bf16.mxu0 %v1592_v17  ;;  %612 = vmatprep.subr.bf16.mxu1 %v1592_v17  ;;  %v1633_v17 = vld [vmem:[#allocation5 + $0x14] ss:$8 sps:$4 sm:$0xff]  }
  0x5c   :  { %p1820_p8 = pnand %p1819_p7, %p1813_p4 }
  0x5d   :  { %1563 = vset.pattern.permute.xlu1 %v1848_v0  ;;  %107 = vperm.xlu0 %1565, %v2013_v15  }
  0x5e   :  { %501 = vperm.xlu1 %1563, %v2000_v11   ;;  %436 = vmatpush1.bf16.msra.mxu0 %v1594_v19 }
  0x5f   :  { %437 = vmatprep.subr.bf16.mxu0 %v1595_v20  ;;  %613 = vmatpush1.bf16.msra.mxu1 %v1594_v19  ;;  %v1631_v19 = vld [vmem:[#allocation5 + $0x10] ss:$8 sps:$4 sm:$0xff]  }
  0x60   :  { %614 = vmatprep.subr.bf16.mxu1 %v1595_v20  ;;  %v1639_v20 = vld [vmem:[#allocation5 + $0x24] ss:$8 sps:$4 sm:$0xff]  }
  0x61   :  { %487 = vperm.xlu0 %1565, %v2018_v18  }
  0x62   :  { %504 = vperm.xlu1 %1563, %v2005_v12   ;;  %438 = vmatpush1.bf16.msra.mxu0 %v1597_v22 }
  0x63   :  { %439 = vmatprep.subr.bf16.mxu0 %v1598_v23  ;;  %615 = vmatpush1.bf16.msra.mxu1 %v1597_v22 }
  0x64   :  { %616 = vmatprep.subr.bf16.mxu1 %v1598_v23  ;;  %v1637_v23 = vld [vmem:[#allocation5 + $0x20] ss:$8 sps:$4 sm:$0xff]  }
  0x65   :  { %1572 = vset.pattern.permute.xlu0 %v1848_v0 }
  0x66   :  { %1566 = vset.pattern.permute.xlu1 %v1850_v7  ;;  %130 = vperm.xlu0 %1572, %v2027_v21  }
  0x67   :  { %180 = vperm.xlu1 %1566, %v89_v3   ;;  %440 = vmatpush1.bf16.msra.mxu0 %v1600_v25  ;;  %v2403_v3 = vmov 0 }
  0x68   :  { %441 = vmatprep.subr.bf16.mxu0 %v1601_v26  ;;  %617 = vmatpush1.bf16.msra.mxu1 %v1600_v25  ;;  %v1645_v25 = vld [vmem:[#allocation5 + $0x34] ss:$8 sps:$4 sm:$0xff]  }
  0x69   :  { %618 = vmatprep.subr.bf16.mxu1 %v1601_v26  ;;  %v1640_v26 = vld [vmem:[#allocation7 + $0x10] ss:$8 sps:$4 sm:$0xff]  }
  0x6a   :  { %510 = vperm.xlu0 %1572, %v2034_v24  }
  0x6b   :  { %1567 = vset.pattern.permute.xlu1 %v1851_v10  ;;  %442 = vmatpush1.bf16.msra.mxu0 %v1603_v27 }
  0x6c   :  { %529 = vperm.xlu1 %1567, %v2000_v11   ;;  %443 = vmatprep.subr.bf16.mxu0 %v1604_v28 }
  0x6d   :  { %619 = vmatpush1.bf16.msra.mxu1 %v1603_v27  ;;  %v1643_v27 = vld [vmem:[#allocation5 + $0x30] ss:$8 sps:$4 sm:$0xff]  }
  0x6e   :  { %1575 = vset.pattern.permute.xlu0 %v1851_v10  ;;  %620 = vmatprep.subr.bf16.mxu1 %v1604_v28  ;;  %v1648_v28 = vld [vmem:[#allocation7 + $0x24] ss:$8 sps:$4 sm:$0xff]  }
  0x6f   :  { %149 = vperm.xlu0 %1575, %v1986_v2   ;;  %444 = vmatpush1.bf16.msra.mxu0 %v1606_v29 }
  0x70   :  { %1568 = vset.pattern.permute.xlu1 %v1850_v7  ;;  %445 = vmatprep.subr.bf16.mxu0 %v1607_v30 }
  0x71   :  { %557 = vperm.xlu1 %1568, %v2000_v11   ;;  %621 = vmatpush1.bf16.msra.mxu1 %v1606_v29 }
  0x72   :  { %622 = vmatprep.subr.bf16.mxu1 %v1607_v30  ;;  %v1651_v30 = vld [vmem:[#allocation5 + $0x44] ss:$8 sps:$4 sm:$0xff]  }
  0x73   :  { %532 = vperm.xlu0 %1575, %v2005_v12   ;;  %446 = vmatpush1.bf16.msra.mxu0 %v1609_v31 }
  0x74   :  { %447 = vmatprep.subr.bf16.mxu0 %v1610_v32 }
  0x75   :  { %560 = vperm.xlu1 %1568, %v2005_v12   ;;  %623 = vmatpush1.bf16.msra.mxu1 %v1609_v31  ;;  %v1646_v31 = vld [vmem:[#allocation7 + $0x20] ss:$8 sps:$4 sm:$0xff]  }
  0x76   :  { %624 = vmatprep.subr.bf16.mxu1 %v1610_v32  ;;  %v1649_v32 = vld [vmem:[#allocation5 + $0x40] ss:$8 sps:$4 sm:$0xff]  }
  0x77   :  { %535 = vperm.xlu0 %1575, %v2018_v18   ;;  %448 = vmatpush1.bf16.msra.mxu0 %v1612_v33 }
  0x78   :  { %449 = vmatprep.subr.bf16.mxu0 %v1613_v34 }
  0x79   :  { %1569 = vset.pattern.permute.xlu1 %v1849_v1  ;;  %625 = vmatpush1.bf16.msra.mxu1 %v1612_v33  ;;  %v1654_v33 = vld [vmem:[#allocation7 + $0x34] ss:$8 sps:$4 sm:$0xff]  }
  0x7a   :  { %110 = vperm.xlu1 %1569, %v2027_v21   ;;  %626 = vmatprep.subr.bf16.mxu1 %v1613_v34 }
  0x7b   :  { %1579 = vset.pattern.permute.xlu0 %v1850_v7  ;;  %450 = vmatpush1.bf16.msra.mxu0 %v1615_v35 }
  0x7c   :  { %566 = vperm.xlu0 %1579, %v2034_v24   ;;  %451 = vmatprep.subr.bf16.mxu0 %v1616_v36 }
  0x7d   :  { %627 = vmatpush1.bf16.msra.mxu1 %v1615_v35  ;;  %v1657_v35 = vld [vmem:[#allocation5 + $0x54] ss:$8 sps:$4 sm:$0xff]  }
  0x7e   :  { %1570 = vset.pattern.permute.xlu1 %v1848_v0  ;;  %628 = vmatprep.subr.bf16.mxu1 %v1616_v36  ;;  %v1652_v36 = vld [vmem:[#allocation7 + $0x30] ss:$8 sps:$4 sm:$0xff]  }
  0x7f   :  { %127 = vperm.xlu1 %1570, %v2013_v15   ;;  %452 = vmatpush1.bf16.msra.mxu0 %v1618_v37 }
  0x80   :  { %453 = vmatprep.subr.bf16.mxu0 %v1619_v38 }
  0x81   :  { %629 = vmatpush1.bf16.msra.mxu1 %v1618_v37  ;;  %v1655_v37 = vld [vmem:[#allocation5 + $0x50] ss:$8 sps:$4 sm:$0xff]  }
  0x82   :  { %630 = vmatprep.subr.bf16.mxu1 %v1619_v38  ;;  %v1660_v38 = vld [vmem:[#allocation7 + $0x44] ss:$8 sps:$4 sm:$0xff]  }
  0x83   :  { %1571 = vset.pattern.permute.xlu1 %v1851_v10  ;;  %454 = vmatpush1.bf16.msra.mxu0 %v1621_v39 }
  0x84   :  { %155 = vperm.xlu1 %1571, %v2013_v15   ;;  %455 = vmatprep.subr.bf16.mxu0 %v1622_v40 }
  0x85   :  { %631 = vmatpush1.bf16.msra.mxu1 %v1621_v39  ;;  %v1663_v39 = vld [vmem:[#allocation5 + $0x64] ss:$8 sps:$4 sm:$0xff]  }
  0x86   :  { %632 = vmatprep.subr.bf16.mxu1 %v1622_v40 }
  0x87   :  { %456 = vmatpush1.bf16.msra.mxu0 %v1624_v41 }
  0x88   :  { %158 = vperm.xlu1 %1571, %v2027_v21   ;;  %457 = vmatprep.subr.bf16.mxu0 %v1625_v42 }
  0x89   :  { %633 = vmatpush1.bf16.msra.mxu1 %v1624_v41  ;;  %v1658_v41 = vld [vmem:[#allocation7 + $0x40] ss:$8 sps:$4 sm:$0xff]  }
  0x8a   :  { %634 = vmatprep.subr.bf16.mxu1 %v1625_v42  ;;  %v1661_v42 = vld [vmem:[#allocation5 + $0x60] ss:$8 sps:$4 sm:$0xff]  }
  0x8b   :  { %458 = vmatpush1.bf16.msra.mxu0 %v1627_v43 }
  0x8c   :  { %1573 = vset.pattern.permute.xlu1 %v1849_v1  ;;  %905 = vmatprep.subr.bf16.mxu0 %v1630_v44  ;;  %v2401_v1 = vmov 0  ;;  %v1669_v44 = vld [vmem:[#allocation5 + $0x74] ss:$8 sps:$4 sm:$0xff]  }
  0x8d   :  { %490 = vperm.xlu1 %1573, %v2034_v24   ;;  %635 = vmatpush1.bf16.msra.mxu1 %v1627_v43  ;;  %v1666_v43 = vld [vmem:[#allocation7 + $0x54] ss:$8 sps:$4 sm:$0xff]  }
  0x8e   :  { %1149 = vmatprep.subr.bf16.mxu1 %v1636_v45 }
  0x91   :  { %1574 = vset.pattern.permute.xlu1 %v1848_v0 }
  0x92   :  { %507 = vperm.xlu1 %1574, %v2018_v18  }
  0x96   :  { %1576 = vset.pattern.permute.xlu1 %v1850_v7 }
  0x97   :  { %183 = vperm.xlu1 %1576, %v2013_v15   ;;  %v1852_v15 = vmov 1.0|1.0  }
  0x9b   :  { %186 = vperm.xlu1 %1576, %v2027_v21   ;;  %v1634_v21 = vld [vmem:[#allocation7] ss:$8 sps:$4 sm:$0xff]  }
  0x9f   :  { %1577 = vset.pattern.permute.xlu1 %v1851_v10  ;;  %v2414_v10 = vmov 0 }
  0xa0   :  { %538 = vperm.xlu1 %1577, %v2034_v24   ;;  %v1642_v24 = vld [vmem:[#allocation7 + $0x14] ss:$8 sps:$4 sm:$0xff]  }
  0xa4   :  { %1578 = vset.pattern.permute.xlu1 %v1850_v7  ;;  %v2409_v7 = vmov 0 }
  0xa5   :  { %563 = vperm.xlu1 %1578, %v2018_v18  }
  0xca   :  { %v122_v46 = vpop.permute.xlu1 %121  ;;  %v102_v47 = vpop.permute.xlu0 %101 }
  0xcb   :  { %vm132_vm0 = vcmp.eq.s32.totalorder %v122_v46, %v2073_v57  ;;  %vm112_vm1 = vcmp.eq.s32.totalorder %v102_v47, %v2073_v57  ;;  %vm133_vm4 = vcmp.eq.s32.totalorder %v122_v46, %v2078_v60  ;;  %vm113_vm5 = vcmp.eq.s32.totalorder %v102_v47, %v2078_v60 }
  0xcc   :  { %vm2088_vm6 = vmor %vm112_vm1, %vm132_vm0 }
  0xcd   :  { %v2400_v63 = vsel %vm2088_vm6, 4294967295, %v2399_v63  ;;  %vm2096_vm11 = vmor %vm113_vm5, %vm133_vm4 }
  0xce   :  { %v125_v48 = vpop.permute.xlu1 %124  ;;  %v2402_v1 = vsel %vm2096_vm11, 4294967295, %v2401_v1 }
  0xcf   :  { %v2068_v49 = vpop.permute.xlu0 %177  ;;  %vm134_vm7 = vcmp.eq.s32.totalorder %v125_v48, %v2073_v57  ;;  %vm135_vm8 = vcmp.eq.s32.totalorder %v125_v48, %v2078_v60  ;;  %v1664_v48 = vld [vmem:[#allocation7 + $0x50] ss:$8 sps:$4 sm:$0xff]  }
  0xd3   :  { %v153_v50 = vpop.permute.xlu1 %152 }
  0xd4   :  { %v105_v51 = vpop.permute.xlu0 %104  ;;  %vm162_vm12 = vcmp.eq.s32.totalorder %v153_v50, %v2073_v57  ;;  %vm163_vm14 = vcmp.eq.s32.totalorder %v153_v50, %v2078_v60  ;;  %v1672_v50 = vld [vmem:[#allocation7 + $0x64] ss:$8 sps:$4 sm:$0xff]  }
  0xd5   :  { %vm114_vm2 = vcmp.eq.s32.totalorder %v105_v51, %v2073_v57  ;;  %vm115_vm3 = vcmp.eq.s32.totalorder %v105_v51, %v2078_v60  ;;  %v1675_v51 = vld [vmem:[#allocation5 + $0x84] ss:$8 sps:$4 sm:$0xff]  }
  0xd6   :  { %vm142_vm9 = vmor %vm114_vm2, %vm134_vm7 }
  0xd7   :  { %vm143_vm10 = vmor %vm115_vm3, %vm135_vm8 }
  0xd8   :  { %v482_v52 = vpop.permute.xlu1 %481  ;;  %v485_v53 = vpop.permute.xlu0 %484  ;;  %vm170_vm1 = vmor %vm142_vm9, %vm162_vm12  ;;  %vm188_vm12 = vcmp.eq.s32.totalorder %v2068_v49, %v2073_v57 }
  0xd9   :  { %vm494_vm15 = vcmp.eq.s32.totalorder %v485_v53, %v2073_v57  ;;  %vm493_vm2 = vcmp.eq.s32.totalorder %v482_v52, %v2078_v60  ;;  %vm171_vm5 = vmor %vm143_vm10, %vm163_vm14  ;;  %vm495_vm7 = vcmp.eq.s32.totalorder %v485_v53, %v2078_v60 }
  0xdc   :  { %v2070_v55 = vpop.permute.xlu0 %107 }
  0xdd   :  { %v502_v56 = vpop.permute.xlu1 %501 }
  0xde   :  { %vm513_vm13 = vcmp.eq.s32.totalorder %v502_v56, %v2078_v60 }
  0xdf   :  { %vm521_vm8 = vmor %vm493_vm2, %vm513_vm13 }
  0xe0   :  { %v2075_v58 = vpop.permute.xlu0 %487 }
  0xe1   :  { %v505_v59 = vpop.permute.xlu1 %504 }
  0xe2   :  { %vm514_vm0 = vcmp.eq.s32.totalorder %v505_v59, %v2073_v57  ;;  %vm515_vm11 = vcmp.eq.s32.totalorder %v505_v59, %v2078_v60 }
  0xe3   :  { %vm2110_vm6 = vmor %vm494_vm15, %vm514_vm0  ;;  %vm2411_vm0 = vnez %v2400_v63 }
  0xe4   :  { %v2404_v3 = vsel %vm2110_vm6, 4294967295, %v2403_v3  ;;  %vm2126_vm13 = vmor %vm495_vm7, %vm515_vm11  ;;  %vm492_vm11 = vcmp.eq.s32.totalorder %v482_v52, %v2073_v57 }
  0xe5   :  { %v2083_v61 = vpop.permute.xlu0 %130  ;;  %v2410_v7 = vsel %vm2126_vm13, 4294967295, %v2409_v7 }
  0xe6   :  { %v181_v62 = vpop.permute.xlu1 %180 }
  0xe7   :  { %vm190_vm3 = vcmp.eq.s32.totalorder %v181_v62, %v2073_v57  ;;  %vm191_vm4 = vcmp.eq.s32.totalorder %v181_v62, %v2078_v60  ;;  %v1678_v62 = vld [vmem:[#allocation7 + $0x74] ss:$8 sps:$4 sm:$0xff]  }
  0xe8   :  { %vm2117_vm10 = vmor %vm170_vm1, %vm190_vm3  ;;  %vm512_vm1 = vcmp.eq.s32.totalorder %v502_v56, %v2073_v57 }
  0xe9   :  { %v2094_v0 = vpop.permute.xlu0 %510  ;;  %v2406_v5 = vsel %vm2117_vm10, 4294967295, %v2405_v5  ;;  %vm2122_vm2 = vmor %vm171_vm5, %vm191_vm4  ;;  %vm189_vm4 = vcmp.eq.s32.totalorder %v2068_v49, %v2078_v60  ;;  %v1667_v49 = vld [vmem:[#allocation5 + $0x70] ss:$8 sps:$4 sm:$0xff]  }
  0xea   :  { %vm2148_vm13 = vmor %vm492_vm11, %vm512_vm1  ;;  %vm2423_vm11 = vnez %v2406_v5  ;;  %v1676_v5 = vld [vmem:[#allocation7 + $0x70] ss:$8 sps:$4 sm:$0xff]  }
  0xeb   :  { %v530_v2 = vpop.permute.xlu1 %529 }
  0xec   :  { %vm541_vm9 = vcmp.eq.s32.totalorder %v530_v2, %v2078_v60 }
  0xed   :  { %vm2134_vm3 = vmor %vm521_vm8, %vm541_vm9  ;;  %vm2419_vm8 = vnez %v2404_v3 }
  0xee   :  { %v150_v4 = vpop.permute.xlu0 %149  ;;  %v2413_v9 = vsel %vm2134_vm3, 4294967295, %v2412_v9 }
  0xef   :  { %vm160_vm14 = vcmp.eq.s32.totalorder %v150_v4, %v2073_v57  ;;  %vm161_vm15 = vcmp.eq.s32.totalorder %v150_v4, %v2078_v60 }
  0xf0   :  { %vm168_vm6 = vmor %vm2411_vm0, %vm160_vm14  ;;  %v558_v8 = vpop.permute.xlu1 %557  ;;  %vm2416_vm14 = vnez %v2402_v1  ;;  %v1681_v1 = vld [vmem:[#allocation5 + $0x94] ss:$8 sps:$4 sm:$0xff]  }
  0xf1   :  { %vm2140_vm5 = vmor %vm168_vm6, %vm188_vm12 }
  0xf2   :  { %v2415_v10 = vsel %vm2140_vm5, 4294967295, %v2414_v10  ;;  %v533_v11 = vpop.permute.xlu0 %532  ;;  %vm169_vm0 = vmor %vm2416_vm14, %vm161_vm15  ;;  %vm569_vm5 = vcmp.eq.s32.totalorder %v558_v8, %v2078_v60 }
  0xf3   :  { %vm542_vm7 = vcmp.eq.s32.totalorder %v533_v11, %v2073_v57  ;;  %vm197_vm6 = vmor %vm169_vm0, %vm189_vm4  ;;  %vm543_vm3 = vcmp.eq.s32.totalorder %v533_v11, %v2078_v60  ;;  %vm2422_vm4 = vnez %v2415_v10  ;;  %vm2425_vm0 = vnez %v2413_v9  ;;  %v1684_v9 = vld [vmem:[#allocation7 + $0x84] ss:$8 sps:$4 sm:$0xff]  }
  0xf4   :  { %vm550_vm9 = vmor %vm2419_vm8, %vm542_vm7  ;;  %v561_v13 = vpop.permute.xlu1 %560  ;;  %v1687_v11 = vld [vmem:[#allocation5 + $0xa4] ss:$8 sps:$4 sm:$0xff]  }
  0xf5   :  { %vm570_vm12 = vcmp.eq.s32.totalorder %v561_v13, %v2073_v57  ;;  %vm1378_vm10 = vmpackc.low %vm2122_vm2, %vm197_vm6  ;;  %vm571_vm1 = vcmp.eq.s32.totalorder %v561_v13, %v2078_v60  ;;  %vm2424_vm2 = vnez %v2410_v7  ;;  %v1682_v13 = vld [vmem:[#allocation7 + $0x80] ss:$8 sps:$4 sm:$0xff]  }
  0xf6   :  { %1379 = vmatprep.mubr.msk.bf16.mxu0 %vm1378_vm10, %v1852_v15  ;;  %vm2160_vm15 = vmor %vm550_vm9, %vm570_vm12  ;;  %vm540_vm10 = vcmp.eq.s32.totalorder %v530_v2, %v2073_v57  ;;  %vm568_vm9 = vcmp.eq.s32.totalorder %v558_v8, %v2073_v57  ;;  %v536_v6 = vpop.permute.xlu0 %535  ;;  %v1679_v8 = vld [vmem:[#allocation5 + $0x90] ss:$8 sps:$4 sm:$0xff]  }
  0xf7   :  { %vm1380_vm7 = vmpackc.low %vm2423_vm11, %vm2422_vm4 }
  0xf8   :  { %1381 = vmatmul.mubr.msk.bf16.vlgmr.msra.gmra.mrb[0].mxu0 %vm1380_vm7, %v1852_v15  ;;  %vm551_vm14 = vmor %vm2424_vm2, %vm543_vm3  ;;  %vm116_vm7 = vcmp.eq.s32.totalorder %v2070_v55, %v2073_v57 }
  0xf9   :  { %v2172_v18 = vpop.permute.xlu1 %110  ;;  %vm577_vm8 = vmor %vm2425_vm0, %vm569_vm5  ;;  %906 = vmatpush1.bf16.msra.mxu0 %v1628_v14 }
  0xfa   :  { %vm579_vm6 = vmor %vm551_vm14, %vm571_vm1  ;;  %907 = vmatprep.subr.bf16.mxu0 %v1633_v17  ;;  %vm139_vm1 = vcmp.eq.s32.totalorder %v2083_v61, %v2078_v60  ;;  %vm119_vm11 = vcmp.eq.s32.totalorder %v2172_v18, %v2078_v60  ;;  %vm117_vm14 = vcmp.eq.s32.totalorder %v2070_v55, %v2078_v60  ;;  %v1670_v55 = vld [vmem:[#allocation7 + $0x60] ss:$8 sps:$4 sm:$0xff]   ;;  %v1690_v17 = vld [vmem:[#allocation7 + $0x94] ss:$8 sps:$4 sm:$0xff]  }
  0xfb   :  { %vm1394_vm12 = vmpackc.low %vm579_vm6, %vm577_vm8  ;;  %v567_v14 = vpop.permute.xlu0 %566 }
  0xfc   :  { %vm548_vm4 = vmor %vm2148_vm13, %vm540_vm10  ;;  %1395 = vmatprep.mubr.msk.bf16.mxu1 %vm1394_vm12, %v1852_v15  ;;  %vm138_vm13 = vcmp.eq.s32.totalorder %v2083_v61, %v2073_v57  ;;  %v1673_v61 = vld [vmem:[#allocation5 + $0x80] ss:$8 sps:$4 sm:$0xff]  }
  0xfd   :  { %vm576_vm3 = vmor %vm548_vm4, %vm568_vm9  ;;  %908 = vmatpush1.bf16.msra.mxu0 %v1631_v19  ;;  %v1693_v19 = vld [vmem:[#allocation5 + $0xb4] ss:$8 sps:$4 sm:$0xff]  }
  0xfe   :  { %v2181_v22 = vpop.permute.xlu1 %127  ;;  %vm1396_vm5 = vmpackc.low %vm2160_vm15, %vm576_vm3  ;;  %909 = vmatprep.subr.bf16.mxu0 %v1639_v20  ;;  %vm118_vm15 = vcmp.eq.s32.totalorder %v2172_v18, %v2073_v57 }
  0xff   :  { %1397 = vmatmul.mubr.msk.bf16.vlgmr.msra.gmra.mrb[0].mxu1 %vm1396_vm5, %v1852_v15  ;;  %vm136_vm2 = vcmp.eq.s32.totalorder %v2181_v22, %v2073_v57  ;;  %vm2203_vm10 = vmor %vm118_vm15, %vm138_vm13  ;;  %vm137_vm0 = vcmp.eq.s32.totalorder %v2181_v22, %v2078_v60  ;;  %vm518_vm15 = vcmp.eq.s32.totalorder %v2094_v0, %v2073_v57  ;;  %v1691_v22 = vld [vmem:[#allocation5 + $0xb0] ss:$8 sps:$4 sm:$0xff]  }
 0x100   :  { %1150 = vmatpush1.bf16.msra.mxu1 %v1634_v21  ;;  %vm2209_vm8 = vmor %vm119_vm11, %vm139_vm1  ;;  %v1688_v21 = vld [vmem:[#allocation7 + $0x90] ss:$8 sps:$4 sm:$0xff]  }
 0x101   :  { %910 = vmatpush1.bf16.msra.mxu0 %v1637_v23  ;;  %1151 = vmatprep.subr.bf16.mxu1 %v1642_v24  ;;  %vm144_vm6 = vmor %vm116_vm7, %vm136_vm2  ;;  %vm519_vm2 = vcmp.eq.s32.totalorder %v2094_v0, %v2078_v60  ;;  %v1696_v23 = vld [vmem:[#allocation7 + $0xa4] ss:$8 sps:$4 sm:$0xff]  }
 0x102   :  { %911 = vmatprep.subr.bf16.mxu0 %v1645_v25  ;;  %vm145_vm4 = vmor %vm117_vm14, %vm137_vm0  ;;  %v1699_v24 = vld [vmem:[#allocation5 + $0xc4] ss:$8 sps:$4 sm:$0xff]  }
 0x103   :  { %v156_v29 = vpop.permute.xlu1 %155 }
 0x104   :  { %1152 = vmatpush1.bf16.msra.mxu1 %v1640_v26  ;;  %vm164_vm9 = vcmp.eq.s32.totalorder %v156_v29, %v2073_v57  ;;  %vm165_vm12 = vcmp.eq.s32.totalorder %v156_v29, %v2078_v60  ;;  %v1702_v29 = vld [vmem:[#allocation7 + $0xb4] ss:$8 sps:$4 sm:$0xff]  }
 0x105   :  { %912 = vmatpush1.bf16.msra.mxu0 %v1643_v27  ;;  %1153 = vmatprep.subr.bf16.mxu1 %v1648_v28  ;;  %vm2216_vm5 = vmor %vm144_vm6, %vm164_vm9  ;;  %vm496_vm6 = vcmp.eq.s32.totalorder %v2075_v58, %v2073_v57  ;;  %v1694_v27 = vld [vmem:[#allocation7 + $0xa0] ss:$8 sps:$4 sm:$0xff]  }
 0x106   :  { %913 = vmatprep.subr.bf16.mxu0 %v1651_v30  ;;  %vm2223_vm1 = vmor %vm145_vm4, %vm165_vm12  ;;  %vm497_vm4 = vcmp.eq.s32.totalorder %v2075_v58, %v2078_v60  ;;  %v1697_v28 = vld [vmem:[#allocation5 + $0xc0] ss:$8 sps:$4 sm:$0xff]   ;;  %v1703_v30 = vld [vmem:[#allocation5 + $0xd0] ss:$8 sps:$4 sm:$0xff]  }
 0x107   :  { %v159_v34 = vpop.permute.xlu1 %158 }
 0x108   :  { %1154 = vmatpush1.bf16.msra.mxu1 %v1646_v31  ;;  %vm166_vm3 = vcmp.eq.s32.totalorder %v159_v34, %v2073_v57  ;;  %vm167_vm13 = vcmp.eq.s32.totalorder %v159_v34, %v2078_v60  ;;  %v1708_v31 = vld [vmem:[#allocation7 + $0xc4] ss:$8 sps:$4 sm:$0xff]   ;;  %v1709_v34 = vld [vmem:[#allocation5 + $0xe0] ss:$8 sps:$4 sm:$0xff]  }
 0x109   :  { %914 = vmatpush1.bf16.msra.mxu0 %v1649_v32  ;;  %1155 = vmatprep.subr.bf16.mxu1 %v1654_v33  ;;  %vm2233_vm14 = vmor %vm2203_vm10, %vm166_vm3  ;;  %v1706_v32 = vld [vmem:[#allocation7 + $0xc0] ss:$8 sps:$4 sm:$0xff]   ;;  %v1711_v33 = vld [vmem:[#allocation5 + $0xe4] ss:$8 sps:$4 sm:$0xff]  }
 0x10a   :  { %915 = vmatprep.subr.bf16.mxu0 %v1657_v35  ;;  %vm2245_vm10 = vmor %vm2209_vm8, %vm167_vm13  ;;  %v1714_v35 = vld [vmem:[#allocation7 + $0xd4] ss:$8 sps:$4 sm:$0xff]  }
 0x10c   :  { %v491_v40 = vpop.permute.xlu1 %490  ;;  %1156 = vmatpush1.bf16.msra.mxu1 %v1652_v36  ;;  %v1712_v36 = vld [vmem:[#allocation7 + $0xd0] ss:$8 sps:$4 sm:$0xff]  }
 0x10d   :  { %916 = vmatpush1.bf16.msra.mxu0 %v1655_v37  ;;  %1157 = vmatprep.subr.bf16.mxu1 %v1660_v38  ;;  %vm498_vm11 = vcmp.eq.s32.totalorder %v491_v40, %v2073_v57  ;;  %vm499_vm0 = vcmp.eq.s32.totalorder %v491_v40, %v2078_v60  ;;  %v1715_v37 = vld [vmem:[#allocation5 + $0xf0] ss:$8 sps:$4 sm:$0xff]   ;;  %v1720_v38 = vld [vmem:[#allocation7 + $0xe4] ss:$8 sps:$4 sm:$0xff]   ;;  %v1723_v40 = vld [vmem:[#allocation7 + $0xf4] ss:$8 sps:$4 sm:$0xff]  }
 0x10e   :  { %917 = vmatprep.subr.bf16.mxu0 %v1663_v39  ;;  %vm2257_vm3 = vmor %vm498_vm11, %vm518_vm15  ;;  %v1718_v39 = vld [vmem:[#allocation7 + $0xe0] ss:$8 sps:$4 sm:$0xff]  }
 0x10f   :  { %vm2273_vm9 = vmor %vm499_vm0, %vm519_vm2 }
 0x110   :  { %1158 = vmatpush1.bf16.msra.mxu1 %v1658_v41  ;;  %v1721_v41 = vld [vmem:[#allocation7 + $0xf0] ss:$8 sps:$4 sm:$0xff]  }
 0x111   :  { %v508_v47 = vpop.permute.xlu1 %507  ;;  %918 = vmatpush1.bf16.msra.mxu0 %v1661_v42  ;;  %1159 = vmatprep.subr.bf16.mxu1 %v1666_v43  ;;  %v258_v42 = vshrl.u32 %v96_v54, 7 }
 0x112   :  { %919 = vmatprep.subr.bf16.mxu0 %v1669_v44  ;;  %vm516_vm7 = vcmp.eq.s32.totalorder %v508_v47, %v2073_v57  ;;  %vm2444_vm15 = vcmp.eq.s32.totalorder %v508_v47, %v2078_v60  ;;  %v99_v44 = vld [vmem:[%s2392_s3] sm:$0x3] }
 0x113   :  { %vm2263_vm8 = vmor %vm496_vm6, %vm516_vm7  ;;  %v259_v43 = vsub.s32 0, %v258_v42  ;;  %v263_v45 = vsub.s32 1, %v258_v42 }
 0x114   :  { %1160 = vmatpush1.bf16.msra.mxu1 %v1664_v48  ;;  %vm2279_vm11 = vmor %vm497_vm4, %vm2444_vm15 }
 0x115   :  { %920 = vmatpush1.bf16.msra.mxu0 %v1667_v49  ;;  %1161 = vmatprep.subr.bf16.mxu1 %v1672_v50  ;;  %v2351_v46 = vrot.slane %v99_v44, %v259_v43  ;;  %v2353_v47 = vrot.slane %v99_v44, %v263_v45 }
 0x116   :  { %v184_v59 = vpop.permute.xlu1 %183  ;;  %921 = vmatprep.subr.bf16.mxu0 %v1675_v51 }
 0x117   :  { %vm192_vm12 = vcmp.eq.s32.totalorder %v184_v59, %v2073_v57  ;;  %vm193_vm13 = vcmp.eq.s32.totalorder %v184_v59, %v2078_v60 }
 0x118   :  { %1162 = vmatpush1.bf16.msra.mxu1 %v1670_v55  ;;  %vm2285_vm7 = vmor %vm2216_vm5, %vm192_vm12  ;;  %vm544_vm12 = vcmp.eq.s32.totalorder %v536_v6, %v2073_v57 }
 0x119   :  { %922 = vmatpush1.bf16.msra.mxu0 %v1673_v61  ;;  %1163 = vmatprep.subr.bf16.mxu1 %v1678_v62  ;;  %vm2291_vm2 = vmor %vm2223_vm1, %vm193_vm13 }
 0x11a   :  { %v187_v0 = vpop.permute.xlu1 %186  ;;  %923 = vmatprep.subr.bf16.mxu0 %v1681_v1 }
 0x11b   :  { %vm194_vm0 = vcmp.eq.s32.totalorder %v187_v0, %v2073_v57  ;;  %vm195_vm6 = vcmp.eq.s32.totalorder %v187_v0, %v2078_v60 }
 0x11c   :  { %vm2299_vm5 = vmor %vm2233_vm14, %vm194_vm0  ;;  %1164 = vmatpush1.bf16.msra.mxu1 %v1676_v5  ;;  %vm574_vm0 = vcmp.eq.s32.totalorder %v567_v14, %v2073_v57 }
 0x11d   :  { %vm203_vm1 = vmor %vm2245_vm10, %vm195_vm6  ;;  %924 = vmatpush1.bf16.msra.mxu0 %v1679_v8  ;;  %1165 = vmatprep.subr.bf16.mxu1 %v1684_v9  ;;  %vm545_vm10 = vcmp.eq.s32.totalorder %v536_v6, %v2078_v60 }
 0x11e   :  { %vm1382_vm4 = vmpackc.low %vm203_vm1, %vm2291_vm2  ;;  %925 = vmatprep.subr.bf16.mxu0 %v1687_v11 }
 0x11f   :  { %1383 = vmatprep.mubr.msk.bf16.mxu0 %vm1382_vm4, %v1852_v15  ;;  %v539_v18 = vpop.permute.xlu1 %538  ;;  %vm1384_vm14 = vmpackc.low %vm2299_vm5, %vm2285_vm7  ;;  %vm575_vm5 = vcmp.eq.s32.totalorder %v567_v14, %v2078_v60 }
 0x120   :  { %vm546_vm13 = vcmp.eq.s32.totalorder %v539_v18, %v2073_v57  ;;  %vm547_vm15 = vcmp.eq.s32.totalorder %v539_v18, %v2078_v60  ;;  %1385 = vmatmul.mubr.msk.bf16.gmra.mrb[4].mxu0 %vm1384_vm14, %v1852_v15  ;;  %vm2321_vm2 = vmor %vm2263_vm8, %vm544_vm12  ;;  %1166 = vmatpush1.bf16.msra.mxu1 %v1682_v13 }
 0x121   :  { %vm554_vm7 = vmor %vm2257_vm3, %vm546_vm13  ;;  %926 = vmatpush1.bf16.msra.mxu0 %v1685_v16  ;;  %1167 = vmatprep.subr.bf16.mxu1 %v1690_v17 }
 0x122   :  { %vm555_vm6 = vmor %vm2273_vm9, %vm547_vm15  ;;  %927 = vmatprep.subr.bf16.mxu0 %v1693_v19 }
 0x123   :  { %vm553_vm8 = vmor %vm2279_vm11, %vm545_vm10 }
 0x124   :  { %vm2335_vm3 = vmor %vm554_vm7, %vm574_vm0  ;;  %v564_v26 = vpop.permute.xlu1 %563  ;;  %1168 = vmatpush1.bf16.msra.mxu1 %v1688_v21 }
 0x125   :  { %vm583_vm12 = vmor %vm555_vm6, %vm575_vm5  ;;  %vm572_vm9 = vcmp.eq.s32.totalorder %v564_v26, %v2073_v57  ;;  %vm573_vm1 = vcmp.eq.s32.totalorder %v564_v26, %v2078_v60  ;;  %928 = vmatpush1.bf16.msra.mxu0 %v1691_v22  ;;  %1169 = vmatprep.subr.bf16.mxu1 %v1696_v23  ;;  %v1700_v57 = vld [vmem:[#allocation7 + $0xb0] ss:$8 sps:$4 sm:$0xff]   ;;  %v1705_v60 = vld [vmem:[#allocation5 + $0xd4] ss:$8 sps:$4 sm:$0xff]  }
 0x126   :  { %vm580_vm4 = vmor %vm2321_vm2, %vm572_vm9  ;;  %929 = vmatprep.subr.bf16.mxu0 %v1699_v24 }
 0x127   :  { %vm581_vm11 = vmor %vm553_vm8, %vm573_vm1 }
 0x128   :  { %vm1398_vm14 = vmpackc.low %vm583_vm12, %vm581_vm11  ;;  %1170 = vmatpush1.bf16.msra.mxu1 %v1694_v27 }
 0x129   :  { %vm1400_vm10 = vmpackc.low %vm2335_vm3, %vm580_vm4  ;;  %1399 = vmatprep.mubr.msk.bf16.mxu1 %vm1398_vm14, %v1852_v15  ;;  %930 = vmatpush1.bf16.msra.mxu0 %v1697_v28 }
 0x12a   :  { %1401 = vmatmul.mubr.msk.bf16.gmra.mrb[4].mxu1 %vm1400_vm10, %v1852_v15  ;;  %1171 = vmatprep.subr.bf16.mxu1 %v1702_v29  ;;  %v1717_v15 = vld [vmem:[#allocation5 + $0xf4] ss:$8 sps:$4 sm:$0xff]  }
 0x12b   :  { %931 = vmatprep.subr.bf16.mxu0 %v1705_v60 }
 0x12c   :  { %1172 = vmatpush1.bf16.msra.mxu1 %v1700_v57 }
 0x12d   :  { %932 = vmatpush1.bf16.msra.mxu0 %v1703_v30  ;;  %1173 = vmatprep.subr.bf16.mxu1 %v1708_v31 }
 0x12e   :  { %933 = vmatprep.subr.bf16.mxu0 %v1711_v33 }
 0x130   :  { %1174 = vmatpush1.bf16.msra.mxu1 %v1706_v32 }
 0x131   :  { %934 = vmatpush1.bf16.msra.mxu0 %v1709_v34  ;;  %1175 = vmatprep.subr.bf16.mxu1 %v1714_v35 }
 0x132   :  { %935 = vmatprep.subr.bf16.mxu0 %v1717_v15 }
 0x134   :  { %1176 = vmatpush1.bf16.msra.mxu1 %v1712_v36 }
 0x135   :  { %936 = vmatpush1.bf16.msra.mxu0 %v1715_v37  ;;  %1177 = vmatprep.subr.bf16.mxu1 %v1720_v38 }
 0x138   :  { %1178 = vmatpush1.bf16.msra.mxu1 %v1718_v39 }
 0x139   :  { %1179 = vmatprep.subr.bf16.mxu1 %v1723_v40 }
 0x13c   :  { %1180 = vmatpush1.bf16.msra.mxu1 %v1721_v41 }
 0x1cb   :  { %v461_v48 = vpop.f32.mrb[0].mxu0 }
 0x1cc   :  { %v462_v49 = vadd.f32 %v461_v48, %v2351_v46  ;;  %v463_v50 = vpop.f32.mrb[1].mxu0 }
 0x1cd   :  { %v464_v51 = vadd.f32 %v463_v50, %v2353_v47  ;;  %v465_v52 = vpop.f32.mrb[2].mxu0 }
 0x1ce   :  { %v665_v53 = vmul.f32 0.1, %v462_v49  ;;  %v466_v54 = vadd.f32 %v465_v52, %v2351_v46  ;;  %v467_v55 = vpop.f32.mrb[3].mxu0  ;;  %vm657_vm13 = vcmp.gt.f32.partialorder %v462_v49, 0.0 }
 0x1cf   :  { %v666_v56 = vmul.f32 0.1, %v464_v51  ;;  %v468_v59 = vadd.f32 %v467_v55, %v2353_v47  ;;  %vm658_vm15 = vcmp.gt.f32.partialorder %v464_v51, 0.0 }
 0x1d0   :  { %vm659_vm2 = vcmp.gt.f32.partialorder %v466_v54, 0.0  ;;  %v667_v61 = vmul.f32 0.1, %v466_v54  ;;  %v673_v63 = vsel %vm657_vm13, %v462_v49, %v665_v53  ;;  %vm1854_vm13 = vmmov 0  }
 0x1d1   :  { %vm660_vm7 = vcmp.gt.f32.partialorder %v468_v59, 0.0  ;;  %v668_v62 = vmul.f32 0.1, %v468_v59  ;;  %v674_v5 = vsel %vm658_vm15, %v464_v51, %v666_v56 }
 0x1d2   :  { %v675_v1 = vsel %vm659_vm2, %v466_v54, %v667_v61  ;;  %v638_v2 = vpop.f32.mrb[0].mxu1  ;;  %v1227_v61 = vld [vmem:[#allocation8] sm:$0xff] }
 0x1d3   :  { %v681_v3 = vpack.c.bf16 %v675_v1, %v673_v63  ;;  %v639_v58 = vadd.f32 %v638_v2, %v2351_v46  ;;  %v640_v4 = vpop.f32.mrb[1].mxu1  ;;  %v676_v6 = vsel %vm660_vm7, %v468_v59, %v668_v62  ;;  %v1229_v62 = vld [vmem:[#allocation8 + $0x10] sm:$0xff]  ;;  %v1853_v63 = vmov 0.0|0.0  }
 0x1d4   :  { %v641_v7 = vadd.f32 %v640_v4, %v2353_v47  ;;  %v642_v0 = vpop.f32.mrb[2].mxu1  ;;  %v682_v8 = vpack.c.bf16 %v676_v6, %v674_v5  ;;  %1520 = vmatprep.subr.bf16.mxu0 %v1853_v63  ;;  %v1233_v5 = vld [vmem:[#allocation8 + $0x30] sm:$0xff]  ;;  %v1234_v6 = vld [vmem:[#allocation8 + $0x38] sm:$0xff] }
 0x1d5   :  { %v693_v9 = vmul.f32 0.1, %v639_v58  ;;  %v643_v10 = vadd.f32 %v642_v0, %v2351_v46  ;;  %v644_v11 = vpop.f32.mrb[3].mxu1  ;;  %vm685_vm0 = vcmp.gt.f32.partialorder %v639_v58, 0.0  ;;  %v1530_v0 = vpack.c.bf16 %v1234_v6, %v1233_v5 }
 0x1d6   :  { %v694_v12 = vmul.f32 0.1, %v641_v7  ;;  %v645_v13 = vadd.f32 %v644_v11, %v2353_v47  ;;  %937 = vmatprep.mubr.bf16.mxu0 %v682_v8  ;;  %vm686_vm6 = vcmp.gt.f32.partialorder %v641_v7, 0.0  ;;  %v1236_v8 = vld [vmem:[#allocation8 + $0x48] sm:$0xff]  ;;  %v1238_v11 = vld [vmem:[#allocation8 + $0x58] sm:$0xff] }
 0x1d7   :  { %vm687_vm5 = vcmp.gt.f32.partialorder %v643_v10, 0.0  ;;  %v695_v14 = vmul.f32 0.1, %v643_v10  ;;  %938 = vmatmul.mubr.bf16.vlgmr.msra.gmra.mrb[8].mxu0 %v681_v3  ;;  %v701_v17 = vsel %vm685_vm0, %v639_v58, %v693_v9  ;;  %v1231_v3 = vld [vmem:[#allocation8 + $0x20] sm:$0xff]  ;;  %v1232_v58 = vld [vmem:[#allocation8 + $0x28] sm:$0xff] }
 0x1d8   :  { %vm688_vm8 = vcmp.gt.f32.partialorder %v645_v13, 0.0  ;;  %v696_v16 = vmul.f32 0.1, %v645_v13  ;;  %v702_v20 = vsel %vm686_vm6, %v641_v7, %v694_v12  ;;  %v1527_v4 = vpack.c.bf16 %v1232_v58, %v1231_v3  ;;  %v1235_v7 = vld [vmem:[#allocation8 + $0x40] sm:$0xff] }
 0x1d9   :  { %v703_v18 = vsel %vm687_vm5, %v643_v10, %v695_v14  ;;  %v1533_v9 = vpack.c.bf16 %v1236_v8, %v1235_v7  ;;  %v1237_v10 = vld [vmem:[#allocation8 + $0x50] sm:$0xff]  ;;  %v1240_v14 = vld [vmem:[#allocation8 + $0x68] sm:$0xff] }
 0x1da   :  { %v709_v19 = vpack.c.bf16 %v703_v18, %v701_v17  ;;  %v704_v21 = vsel %vm688_vm8, %v645_v13, %v696_v16  ;;  %v1536_v12 = vpack.c.bf16 %v1238_v11, %v1237_v10  ;;  %v1239_v13 = vld [vmem:[#allocation8 + $0x60] sm:$0xff]  ;;  %v1241_v17 = vld [vmem:[#allocation8 + $0x70] sm:$0xff]  ;;  %v1242_v18 = vld [vmem:[#allocation8 + $0x78] sm:$0xff] }
 0x1db   :  { %v710_v22 = vpack.c.bf16 %v704_v21, %v702_v20  ;;  %v1539_v16 = vpack.c.bf16 %v1240_v14, %v1239_v13  ;;  %v1542_v20 = vpack.c.bf16 %v1242_v18, %v1241_v17 }
 0x1dd   :  { %1181 = vmatprep.mubr.bf16.mxu1 %v710_v22 }
 0x1de   :  { %1182 = vmatmul.mubr.bf16.vlgmr.msra.gmra.mrb[8].mxu1 %v709_v19  ;;  %v1855_v19 = vmov 0.0  }
 0x1f3   :  { %v471_v23 = vpop.f32.mrb[4].mxu0 }
 0x1f4   :  { %v472_v24 = vadd.f32 %v471_v23, %v2351_v46  ;;  %v473_v25 = vpop.f32.mrb[5].mxu0 }
 0x1f5   :  { %v474_v26 = vadd.f32 %v473_v25, %v2353_v47  ;;  %v475_v27 = vpop.f32.mrb[6].mxu0 }
 0x1f6   :  { %v669_v28 = vmul.f32 0.1, %v472_v24  ;;  %v476_v29 = vadd.f32 %v475_v27, %v2351_v46  ;;  %v477_v57 = vpop.f32.mrb[7].mxu0  ;;  %vm661_vm3 = vcmp.gt.f32.partialorder %v472_v24, 0.0 }
 0x1f7   :  { %v670_v60 = vmul.f32 0.1, %v474_v26  ;;  %v478_v30 = vadd.f32 %v477_v57, %v2353_v47  ;;  %vm662_vm12 = vcmp.gt.f32.partialorder %v474_v26, 0.0 }
 0x1f8   :  { %vm663_vm9 = vcmp.gt.f32.partialorder %v476_v29, 0.0  ;;  %v671_v31 = vmul.f32 0.1, %v476_v29  ;;  %v677_v33 = vsel %vm661_vm3, %v472_v24, %v669_v28 }
 0x1f9   :  { %vm664_vm1 = vcmp.gt.f32.partialorder %v478_v30, 0.0  ;;  %v672_v32 = vmul.f32 0.1, %v478_v30  ;;  %v678_v35 = vsel %vm662_vm12, %v474_v26, %v670_v60 }
 0x1fa   :  { %v679_v34 = vsel %vm663_vm9, %v476_v29, %v671_v31 }
 0x1fb   :  { %v680_v36 = vsel %vm664_vm1, %v478_v30, %v672_v32  ;;  %v683_v15 = vpack.c.bf16 %v679_v34, %v677_v33  ;;  %v1466_v32 = vld [vmem:[%s2395_s6] ss:$0 sm:$0xff] }
 0x1fc   :  { %v684_v37 = vpack.c.bf16 %v680_v36, %v678_v35 }
 0x1fd   :  { %v648_v38 = vpop.f32.mrb[4].mxu1 }
 0x1fe   :  { %v649_v39 = vadd.f32 %v648_v38, %v2351_v46  ;;  %v650_v40 = vpop.f32.mrb[5].mxu1  ;;  %946 = vmatprep.mubr.bf16.mxu0 %v684_v37 }
 0x1ff   :  { %v651_v41 = vadd.f32 %v650_v40, %v2353_v47  ;;  %v652_v42 = vpop.f32.mrb[6].mxu1  ;;  %947 = vmatmul.mubr.bf16.gmra.mrb[12].mxu0 %v683_v15 }
 0x200   :  { %v697_v43 = vmul.f32 0.1, %v649_v39  ;;  %v653_v44 = vadd.f32 %v652_v42, %v2351_v46  ;;  %v654_v45 = vpop.f32.mrb[7].mxu1  ;;  %vm689_vm4 = vcmp.gt.f32.partialorder %v649_v39, 0.0  ;;  %v1228_v46 = vld [vmem:[#allocation8 + $0x8] sm:$0xff]  ;;  %1517 = vmatprep.mubr.msk.f32.mxu0 %vm1854_vm13, %v1855_v19 }
 0x201   :  { %v698_v48 = vmul.f32 0.1, %v651_v41  ;;  %v655_v49 = vadd.f32 %v654_v45, %v2353_v47  ;;  %vm690_vm11 = vcmp.gt.f32.partialorder %v651_v41, 0.0  ;;  %v1521_v1 = vpack.c.bf16 %v1228_v46, %v1227_v61  ;;  %v1230_v47 = vld [vmem:[#allocation8 + $0x18] sm:$0xff] }
 0x202   :  { %vm691_vm14 = vcmp.gt.f32.partialorder %v653_v44, 0.0  ;;  %v699_v50 = vmul.f32 0.1, %v653_v44  ;;  %v705_v52 = vsel %vm689_vm4, %v649_v39, %v697_v43  ;;  %v1524_v2 = vpack.c.bf16 %v1230_v47, %v1229_v62 }
 0x203   :  { %vm692_vm10 = vcmp.gt.f32.partialorder %v655_v49, 0.0  ;;  %v700_v51 = vmul.f32 0.1, %v655_v49  ;;  %v706_v54 = vsel %vm690_vm11, %v651_v41, %v698_v48  ;;  %1522 = vmatpush3.bf16.msra.mxu0 %v1521_v1 }
 0x204   :  { %v707_v53 = vsel %vm691_vm14, %v653_v44, %v699_v50  ;;  %1523 = vmatprep.subr.bf16.mxu0 %v1853_v63 }
 0x205   :  { %v708_v55 = vsel %vm692_vm10, %v655_v49, %v700_v51  ;;  %v711_v56 = vpack.c.bf16 %v707_v53, %v705_v52 }
 0x206   :  { %v712_v59 = vpack.c.bf16 %v708_v55, %v706_v54  ;;  %v1467_v54 = vld [vmem:[%s2397_s8] ss:$0 sm:$0xff] }
 0x207   :  { %1525 = vmatpush3.bf16.msra.mxu0 %v1524_v2 }
 0x208   :  { %1191 = vmatprep.mubr.bf16.mxu1 %v712_v59  ;;  %1526 = vmatprep.subr.bf16.mxu0 %v1853_v63 }
 0x209   :  { %1192 = vmatmul.mubr.bf16.gmra.mrb[12].mxu1 %v711_v56 }
 0x20b   :  { %1528 = vmatpush3.bf16.msra.mxu0 %v1527_v4 }
 0x20c   :  { %1529 = vmatprep.subr.bf16.mxu0 %v1853_v63 }
 0x20f   :  { %1531 = vmatpush3.bf16.msra.mxu0 %v1530_v0 }
 0x210   :  { %1532 = vmatprep.subr.bf16.mxu0 %v1853_v63 }
 0x213   :  { %1534 = vmatpush3.bf16.msra.mxu0 %v1533_v9 }
 0x214   :  { %1535 = vmatprep.subr.bf16.mxu0 %v1853_v63 }
 0x217   :  { %1537 = vmatpush3.bf16.msra.mxu0 %v1536_v12 }
 0x218   :  { %1538 = vmatprep.subr.bf16.mxu0 %v1853_v63 }
 0x21b   :  { %1540 = vmatpush3.bf16.msra.mxu0 %v1539_v16 }
 0x21c   :  { %1541 = vmatprep.subr.bf16.mxu0 %v1853_v63 }
 0x21f   :  { %1543 = vmatpush3.bf16.msra.mxu0 %v1542_v20 }
 0x2aa   :  { %v939_v21 = vpop.f32.mrb[8].mxu0 }
 0x2ab   :  { %v941_v22 = vpop.f32.mrb[9].mxu0 }
 0x2ac   :  { %v942_v23 = vpop.f32.mrb[10].mxu0 }
 0x2ad   :  { %v944_v24 = vpop.f32.mrb[11].mxu0 }
 0x2b1   :  { %v1183_v25 = vpop.f32.mrb[8].mxu1 }
 0x2b2   :  { %v1202_v26 = vadd.f32 %v1183_v25, %v942_v23  ;;  %v1185_v27 = vpop.f32.mrb[9].mxu1 }
 0x2b3   :  { %v1205_v28 = vadd.f32 %v1185_v27, %v939_v21  ;;  %v1187_v29 = vpop.f32.mrb[10].mxu1 }
 0x2b4   :  { %v1189_v57 = vpop.f32.mrb[11].mxu1 }
 0x2b5   :  { %v1209_v60 = vadd.f32 %v1205_v28, %v944_v24  ;;  %v1206_v30 = vadd.f32 %v1202_v26, %v1189_v57 }
 0x2b7   :  { %v1220_v37 = vadd.f32 %v1466_v32, %v1209_v60 }
 0x2d2   :  { %v948_v31 = vpop.f32.mrb[12].mxu0 }
 0x2d3   :  { %v1203_v33 = vadd.f32 %v1187_v29, %v948_v31  ;;  %v950_v34 = vpop.f32.mrb[13].mxu0 }
 0x2d4   :  { %v1210_v35 = vadd.f32 %v1206_v30, %v950_v34  ;;  %v952_v36 = vpop.f32.mrb[14].mxu0 }
 0x2d5   :  { %v954_v15 = vpop.f32.mrb[15].mxu0 }
 0x2d6   :  { %v1221_v38 = vadd.f32 %v1466_v32, %v1210_v35 }
 0x2d8   :  { %v1224_v39 = vmax.f32 %v1220_v37, %v1221_v38 }
 0x2dc   :  { %v1193_v40 = vpop.f32.mrb[12].mxu1 }
 0x2dd   :  { %v1204_v41 = vadd.f32 %v1193_v40, %v952_v36  ;;  %v1195_v42 = vpop.f32.mrb[13].mxu1 }
 0x2de   :  { %v1207_v43 = vadd.f32 %v1203_v33, %v1195_v42  ;;  %v1197_v44 = vpop.f32.mrb[14].mxu1 }
 0x2df   :  { %v1198_v45 = vpop.f32.mrb[15].mxu1 }
 0x2e0   :  { %v1211_v48 = vadd.f32 %v1207_v43, %v954_v15  ;;  %v1208_v49 = vadd.f32 %v1204_v41, %v1198_v45 }
 0x2e2   :  { %v1222_v50 = vadd.f32 %v1466_v32, %v1211_v48  ;;  %v1223_v51 = vadd.f32 %v1466_v32, %v1208_v49 }
 0x2e4   :  { %v1225_v52 = vmax.f32 %v1224_v39, %v1222_v50 }
 0x2e6   :  { %v1226_v53 = vmax.f32 %v1225_v52, %v1223_v51 }
 0x2e8   :  { %1518 = vmatmul.mubr.f32.vlgmr.msra.gmra.mrb[16].mxu0 %v1226_v53 }
 0x3bb   :  { %v1316_v55 = vpop.f32.mrb[16].mxu0 }
 0x3bc   :  { %v1317_v56 = vadd.f32 %v1467_v54, %v1316_v55  ;;  %v1519_v59 = vpop.f32.mrb[17].mxu0 }
 0x3be   :  { %1320 = vst [vmem:[#allocation10] sm:$0xff] %v1317_v56 }
 0x3bf   :  { %1823 = shalt.err (!%p1820_p8)
}
 0x3c0   :  { %s1824_s5 = scalar_lea.hbm %s2398_s9, 128 }
 0x3c1   :  { %p1825_p9 = scmp.ne.s32.totalorder %s2398_s9, %s1824_s5  ;;  %p1828_p10 = scmp.lt.u32.totalorder %s1824_s5, %s2398_s9 }
 0x3c3   :  { %p1830_p11 = pnand %p1828_p10, %p1825_p9 }
 0x3c5   :  { %1833 = shalt.err (!%p1830_p11)
}
 0x3c6   :  { %1330 = dma.vmem_to_hbm [thread:$0]  %s1328_s13, 128, %s2398_s9, [#allocation4]  }
 0x3c7   :  { %1840 = dma.done.wait [#allocation4], 128  }
 0x3c8   :  { %1841 = vsyncadd [#allocation4], 4294967168 }
 0x3c9   :  { %1334 = vsyncpa [#allocation3], 1 }
 0x3ca   :  { %1335 = vsyncpa [#allocation6], 1 }
 0x3cb   :  { %1336 = vsyncpa [#allocation9], 1 }
 0x3cc   :  { %1337 = vsyncpa [#allocation4], 1 }

</bundles_post_ra>
